<compile_context>
chip_gen: v7x
topology: tpu7x:2x2x1
jax: 0.10.0
libtpu: 0.0.40
codegen_flags: <defaults>
</compile_context>

<pallas_src>
import functools

import jax
import jax.numpy as jnp
from jax import lax
from jax.experimental import pallas as pl
from jax.experimental.pallas import tpu as pltpu


def _conv2d_kernel(x_ref, w_ref, b_ref, o_ref, lhs_ref, *,
                   KH, KW, th, OW, Cp, apply_relu):
    """One grid step: one fused MXU matmul for a (th x OW) block of output rows.

    x_ref:   (Hp, Wp, Cp)       padded NHWC image, channels lane-padded, f32,
                                resident across row blocks
    w_ref:   (KH*KW*Cp, OCp)    fused im2col weight (bf16)
    b_ref:   (1, OCp)           f32 bias (lane-padded)
    o_ref:   (th*OW, OCp)       flattened output rows for this block
    lhs_ref: (th*OW, KH*KW*Cp)  VMEM scratch: fused-im2col LHS (bf16),
                                assembled in-kernel, never written to HBM
    """
    r = pl.program_id(1)
    row_start = pl.multiple_of(r * th, th)
    M = th * OW

    # Fused im2col: every tap is a full-tile, 128-lane-aligned store into the
    # LHS scratch (Cp is a multiple of 128) -> no masked stores, no relayout,
    # no accumulator.  The only cast is the one-way f32 -> bf16 cast of each
    # element actually consumed by the MXU.
    for kh in range(KH):
        rows = x_ref[pl.ds(row_start + kh, th), :, :]          # (th, Wp, Cp) f32
        for kw in range(KW):
            patch = rows[:, kw:kw + OW, :]                     # (th, OW, Cp)
            piece = patch.reshape(M, Cp)                       # leading-dim merge
            t = kh * KW + kw
            lhs_ref[:, t * Cp:(t + 1) * Cp] = piece.astype(w_ref.dtype)

    # Single MXU matmul with the whole KH*KW*Cp contraction fused into K
    # (was: KH*KW per-tap matmuls with K=C plus accumulator adds).
    acc = jnp.dot(lhs_ref[...], w_ref[...], preferred_element_type=jnp.float32)
    acc = acc + b_ref[...]                                     # f32 epilogue
    if apply_relu:
        acc = jnp.maximum(acc, 0.0)
    o_ref[...] = acc.astype(o_ref.dtype)


def _round_up(x, m):
    return ((x + m - 1) // m) * m


def _vmem_limit_bytes():
    """Generation-aware VMEM budget (v5e/v6e: 128 MiB, v7x: 64 MiB physical)."""
    try:
        cap = int(pltpu.get_tpu_info().vmem_capacity_bytes)
    except Exception:                      # interpret mode / older runtimes
        cap = 64 * 1024 * 1024             # assume the smallest (v7x per-core)
    return min((cap * 3) // 4, 96 * 1024 * 1024)


def _target_rows(vmem_limit, Kf, OCp, Hp, Wp, Cp):
    """How many flattened output rows (th*OW) comfortably fit per grid step."""
    fixed = 2 * Hp * Wp * Cp * 4           # resident padded image (x2 buffers), f32
    fixed += 2 * Kf * OCp * 2              # fused weight (x2 buffers), bf16
    fixed += 2 * 8 * OCp * 4               # bias
    per_row = Kf * 2 + 2 * OCp * 4 + 2 * Cp * 4   # LHS scratch + out block + slack
    budget = vmem_limit // 2 - fixed       # keep half the limit as headroom
    return int(max(8, min(budget // per_row, 4096)))


def _pick_row_block(OH, OW, target_rows):
    """Largest divisor th of OH with th*OW <= target and 8-aligned (sublane
    rule); falls back to th = OH (block == full dim, always legal)."""
    th = OH
    for cand in range(1, OH + 1):
        if OH % cand == 0 and cand * OW <= target_rows and (cand * OW) % 8 == 0:
            th = cand
    return th


def conv2d_forward(x, weight, bias, *, stride=1, padding=0, relu=True,
                   compute_dtype=jnp.bfloat16):
    """x: (N, C, H, W), weight: (OC, C, KH, KW), bias: (OC,) -> (N, OC, OH, OW)."""
    if stride != 1:
        # TODO(synk): strided tap extraction not implemented; module default is 1.
        raise NotImplementedError("conv2d_forward: only stride=1 is implemented")

    N, C, H, W = x.shape
    OC, _, KH, KW = weight.shape
    out_dtype = x.dtype

    Hp, Wp = H + 2 * padding, W + 2 * padding
    OH, OW = Hp - KH + 1, Wp - KW + 1

    # Lane-tile padding.  Cp costs no VMEM (the (..., Wp, C) block is
    # lane-padded to 128 regardless) and keeps every scratch store tile
    # aligned; OCp keeps the output and every MXU result tile lane-dense.
    Cp = max(128, _round_up(C, 128))
    OCp = max(128, _round_up(OC, 128))
    Kf = KH * KW * Cp

    # Padded NHWC image in f32 — no in-kernel bf16<->f32 round trip.
    # (The NCHW->NHWC transpose is the PyTorch boundary only.)
    x_nhwc = jnp.transpose(x, (0, 2, 3, 1)).astype(jnp.float32)
    x_pad = jnp.pad(
        x_nhwc, ((0, 0), (padding, padding), (padding, padding), (0, Cp - C)))

    # Fused im2col weight: (OC, C, KH, KW) -> (KH*KW*Cp, OCp) bf16, with zero
    # rows for the channel pad (so pad lanes of the LHS contribute nothing).
    w = jnp.transpose(weight, (2, 3, 1, 0))                    # (KH, KW, C, OC)
    w = jnp.pad(w, ((0, 0), (0, 0), (0, Cp - C), (0, OCp - OC)))
    w = w.reshape(Kf, OCp).astype(compute_dtype)
    b = jnp.pad(bias, (0, OCp - OC)).astype(jnp.float32).reshape(1, OCp)

    vmem_limit = _vmem_limit_bytes()
    th = _pick_row_block(OH, OW, _target_rows(vmem_limit, Kf, OCp, Hp, Wp, Cp))
    num_rb = OH // th

    kernel = functools.partial(
        _conv2d_kernel, KH=KH, KW=KW, th=th, OW=OW, Cp=Cp, apply_relu=relu)

    out = pl.pallas_call(
        kernel,
        out_shape=jax.ShapeDtypeStruct((N, OH * OW, OCp), out_dtype),
        grid_spec=pltpu.PrefetchScalarGridSpec(
            num_scalar_prefetch=0,
            grid=(N, num_rb),
            in_specs=[
                # Padded image: constant block index over the row-block axis
                # -> fetched once per image, resident across the inner axis.
                pl.BlockSpec((None, Hp, Wp, Cp), lambda n, r: (n, 0, 0, 0)),
                # Weight / bias: constant blocks, fetched once and resident.
                pl.BlockSpec((Kf, OCp), lambda n, r: (0, 0)),
                pl.BlockSpec((1, OCp), lambda n, r: (0, 0)),
            ],
            out_specs=pl.BlockSpec((None, th * OW, OCp), lambda n, r: (n, r, 0)),
            scratch_shapes=[pltpu.VMEM((th * OW, Kf), compute_dtype)],
        ),
        compiler_params=pltpu.CompilerParams(
            # Batch axis is the megacore ("parallel") axis so a v7x core pair
            # splits images instead of duplicating the resident padded image.
            dimension_semantics=("parallel", "arbitrary"),
            vmem_limit_bytes=vmem_limit,
        ),
    )(x_pad, w, b)

    # PyTorch NCHW boundary only; in an NHWC pipeline the slice/transpose (and
    # the OCp-padded f32 write amplification) fold into the neighbouring ops.
    out = out[:, :, :OC].reshape(N, OH, OW, OC)
    return jnp.transpose(out, (0, 3, 1, 2))


def init_conv2d_params(key, in_channels, out_channels, kernel_size):
    """Deterministic parameter init matching nn.Conv2d + xavier_normal weight."""
    k_w, k_b = jax.random.split(key)
    fan_in = in_channels * kernel_size * kernel_size
    fan_out = out_channels * kernel_size * kernel_size
    std = (2.0 / (fan_in + fan_out)) ** 0.5          # xavier normal
    weight = std * jax.random.normal(
        k_w, (out_channels, in_channels, kernel_size, kernel_size), jnp.float32
    )
    bound = 1.0 / (fan_in ** 0.5)                    # PyTorch Conv2d bias init
    bias = jax.random.uniform(
        k_b, (out_channels,), jnp.float32, minval=-bound, maxval=bound
    )
    return weight, bias


if __name__ == "__main__":
    key = jax.random.PRNGKey(0)
    k_x, k_p = jax.random.split(key)

    # Module config: Conv2d(in_channels=4, out_channels=8, kernel_size=3,
    #                       stride=1, relu=True, same_padding=True, bn=False)
    in_channels, out_channels, kernel_size = 4, 8, 3
    same_padding = True
    padding = (kernel_size - 1) // 2 if same_padding else 0

    x = jax.random.normal(k_x, (2, in_channels, 16, 16), jnp.float32)
    weight, bias = init_conv2d_params(k_p, in_channels, out_channels, kernel_size)

    out = conv2d_forward(x, weight, bias, stride=1, padding=padding, relu=True)
    out = jax.block_until_ready(out)

    # Reference (f32 XLA conv + bias + ReLU).
    ref = lax.conv_general_dilated(
        x, weight, window_strides=(1, 1),
        padding=[(padding, padding), (padding, padding)],
        dimension_numbers=("NCHW", "OIHW", "NCHW"),
    ) + bias.reshape(1, -1, 1, 1)
    ref = jnp.maximum(ref, 0.0)

    assert out.shape == (2, out_channels, 16, 16)
    # bf16 MXU operands with f32 accumulation -> tolerance loosened vs pure f32.
    assert jnp.allclose(out, ref, atol=5e-2, rtol=5e-2), float(
        jnp.max(jnp.abs(out - ref))
    )
    print("KERNEL_OK")
</pallas_src>

<mosaic_0001>
module attributes {stable_mosaic.version = 11 : i64} {
  func.func @_conv2d_kernel(%arg0: i32, %arg1: i32, %arg2: memref<1x18x18x128xf32, #tpu.memory_space<vmem>>, %arg3: memref<1152x128xbf16, #tpu.memory_space<vmem>>, %arg4: memref<1x128xf32, #tpu.memory_space<vmem>>, %arg5: memref<1x256x128xf32, #tpu.memory_space<vmem>>, %arg6: memref<256x1152xbf16, #tpu.memory_space<vmem>>) attributes {dimension_semantics = [#tpu.dimension_semantics<parallel>, #tpu.dimension_semantics<arbitrary>], iteration_bounds = array<i64: 2, 1>, scalar_prefetch = 0 : i64, scratch_operands = 1 : i64, tpu.core_type = #tpu.core_type<tc>, window_params = [{transform_indices = @transform_0, window_bounds = array<i64: 1, 18, 18, 128>}, {pipeline_mode = #tpu.pipeline_mode<synchronous>, transform_indices = @transform_1, window_bounds = array<i64: 1152, 128>}, {pipeline_mode = #tpu.pipeline_mode<synchronous>, transform_indices = @transform_2, window_bounds = array<i64: 1, 128>}, {transform_indices = @transform_3, window_bounds = array<i64: 1, 256, 128>}]} {
    %c16_i32 = arith.constant 16 : i32
    %0 = arith.muli %arg1, %c16_i32 : i32
    %1 = tpu.assume_multiple %0, 16 : i32
    %c0_i32 = arith.constant 0 : i32
    %2 = arith.addi %1, %c0_i32 : i32
    %c0 = arith.constant 0 : index
    %3 = arith.index_cast %2 : i32 to index
    %c0_0 = arith.constant 0 : index
    %c0_1 = arith.constant 0 : index
    %4 = vector.load %arg2[%c0, %3, %c0_0, %c0_1] : memref<1x18x18x128xf32, #tpu.memory_space<vmem>>, vector<1x16x18x128xf32>
    %5 = vector.shape_cast %4 : vector<1x16x18x128xf32> to vector<16x18x128xf32>
    %6 = vector.extract_strided_slice %5 {offsets = [0, 0, 0], sizes = [16, 16, 128], strides = [1, 1, 1]} : vector<16x18x128xf32> to vector<16x16x128xf32>
    %7 = vector.shape_cast %6 : vector<16x16x128xf32> to vector<256x128xf32>
    %8 = arith.truncf %7 : vector<256x128xf32> to vector<256x128xbf16>
    %c0_2 = arith.constant 0 : index
    %c0_3 = arith.constant 0 : index
    %9 = vector.load %arg6[%c0_2, %c0_3] : memref<256x1152xbf16, #tpu.memory_space<vmem>>, vector<256x128xbf16>
    tpu.vector_store %arg6[%c0_2, %c0_3], %8 {strides = array<i32>} : memref<256x1152xbf16, #tpu.memory_space<vmem>>, vector<256x128xbf16>,
    %10 = vector.extract_strided_slice %5 {offsets = [0, 1, 0], sizes = [16, 16, 128], strides = [1, 1, 1]} : vector<16x18x128xf32> to vector<16x16x128xf32>
    %11 = vector.shape_cast %10 : vector<16x16x128xf32> to vector<256x128xf32>
    %12 = arith.truncf %11 : vector<256x128xf32> to vector<256x128xbf16>
    %c0_4 = arith.constant 0 : index
    %c128 = arith.constant 128 : index
    %13 = vector.load %arg6[%c0_4, %c128] : memref<256x1152xbf16, #tpu.memory_space<vmem>>, vector<256x128xbf16>
    tpu.vector_store %arg6[%c0_4, %c128], %12 {strides = array<i32>} : memref<256x1152xbf16, #tpu.memory_space<vmem>>, vector<256x128xbf16>,
    %14 = vector.extract_strided_slice %5 {offsets = [0, 2, 0], sizes = [16, 16, 128], strides = [1, 1, 1]} : vector<16x18x128xf32> to vector<16x16x128xf32>
    %15 = vector.shape_cast %14 : vector<16x16x128xf32> to vector<256x128xf32>
    %16 = arith.truncf %15 : vector<256x128xf32> to vector<256x128xbf16>
    %c0_5 = arith.constant 0 : index
    %c256 = arith.constant 256 : index
    %17 = vector.load %arg6[%c0_5, %c256] : memref<256x1152xbf16, #tpu.memory_space<vmem>>, vector<256x128xbf16>
    tpu.vector_store %arg6[%c0_5, %c256], %16 {strides = array<i32>} : memref<256x1152xbf16, #tpu.memory_space<vmem>>, vector<256x128xbf16>,
    %c1_i32 = arith.constant 1 : i32
    %18 = arith.addi %1, %c1_i32 : i32
    %c0_6 = arith.constant 0 : index
    %19 = arith.index_cast %18 : i32 to index
    %c0_7 = arith.constant 0 : index
    %c0_8 = arith.constant 0 : index
    %20 = vector.load %arg2[%c0_6, %19, %c0_7, %c0_8] : memref<1x18x18x128xf32, #tpu.memory_space<vmem>>, vector<1x16x18x128xf32>
    %21 = vector.shape_cast %20 : vector<1x16x18x128xf32> to vector<16x18x128xf32>
    %22 = vector.extract_strided_slice %21 {offsets = [0, 0, 0], sizes = [16, 16, 128], strides = [1, 1, 1]} : vector<16x18x128xf32> to vector<16x16x128xf32>
    %23 = vector.shape_cast %22 : vector<16x16x128xf32> to vector<256x128xf32>
    %24 = arith.truncf %23 : vector<256x128xf32> to vector<256x128xbf16>
    %c0_9 = arith.constant 0 : index
    %c384 = arith.constant 384 : index
    %25 = vector.load %arg6[%c0_9, %c384] : memref<256x1152xbf16, #tpu.memory_space<vmem>>, vector<256x128xbf16>
    tpu.vector_store %arg6[%c0_9, %c384], %24 {strides = array<i32>} : memref<256x1152xbf16, #tpu.memory_space<vmem>>, vector<256x128xbf16>,
    %26 = vector.extract_strided_slice %21 {offsets = [0, 1, 0], sizes = [16, 16, 128], strides = [1, 1, 1]} : vector<16x18x128xf32> to vector<16x16x128xf32>
    %27 = vector.shape_cast %26 : vector<16x16x128xf32> to vector<256x128xf32>
    %28 = arith.truncf %27 : vector<256x128xf32> to vector<256x128xbf16>
    %c0_10 = arith.constant 0 : index
    %c512 = arith.constant 512 : index
    %29 = vector.load %arg6[%c0_10, %c512] : memref<256x1152xbf16, #tpu.memory_space<vmem>>, vector<256x128xbf16>
    tpu.vector_store %arg6[%c0_10, %c512], %28 {strides = array<i32>} : memref<256x1152xbf16, #tpu.memory_space<vmem>>, vector<256x128xbf16>,
    %30 = vector.extract_strided_slice %21 {offsets = [0, 2, 0], sizes = [16, 16, 128], strides = [1, 1, 1]} : vector<16x18x128xf32> to vector<16x16x128xf32>
    %31 = vector.shape_cast %30 : vector<16x16x128xf32> to vector<256x128xf32>
    %32 = arith.truncf %31 : vector<256x128xf32> to vector<256x128xbf16>
    %c0_11 = arith.constant 0 : index
    %c640 = arith.constant 640 : index
    %33 = vector.load %arg6[%c0_11, %c640] : memref<256x1152xbf16, #tpu.memory_space<vmem>>, vector<256x128xbf16>
    tpu.vector_store %arg6[%c0_11, %c640], %32 {strides = array<i32>} : memref<256x1152xbf16, #tpu.memory_space<vmem>>, vector<256x128xbf16>,
    %c2_i32 = arith.constant 2 : i32
    %34 = arith.addi %1, %c2_i32 : i32
    %c0_12 = arith.constant 0 : index
    %35 = arith.index_cast %34 : i32 to index
    %c0_13 = arith.constant 0 : index
    %c0_14 = arith.constant 0 : index
    %36 = vector.load %arg2[%c0_12, %35, %c0_13, %c0_14] : memref<1x18x18x128xf32, #tpu.memory_space<vmem>>, vector<1x16x18x128xf32>
    %37 = vector.shape_cast %36 : vector<1x16x18x128xf32> to vector<16x18x128xf32>
    %38 = vector.extract_strided_slice %37 {offsets = [0, 0, 0], sizes = [16, 16, 128], strides = [1, 1, 1]} : vector<16x18x128xf32> to vector<16x16x128xf32>
    %39 = vector.shape_cast %38 : vector<16x16x128xf32> to vector<256x128xf32>
    %40 = arith.truncf %39 : vector<256x128xf32> to vector<256x128xbf16>
    %c0_15 = arith.constant 0 : index
    %c768 = arith.constant 768 : index
    %41 = vector.load %arg6[%c0_15, %c768] : memref<256x1152xbf16, #tpu.memory_space<vmem>>, vector<256x128xbf16>
    tpu.vector_store %arg6[%c0_15, %c768], %40 {strides = array<i32>} : memref<256x1152xbf16, #tpu.memory_space<vmem>>, vector<256x128xbf16>,
    %42 = vector.extract_strided_slice %37 {offsets = [0, 1, 0], sizes = [16, 16, 128], strides = [1, 1, 1]} : vector<16x18x128xf32> to vector<16x16x128xf32>
    %43 = vector.shape_cast %42 : vector<16x16x128xf32> to vector<256x128xf32>
    %44 = arith.truncf %43 : vector<256x128xf32> to vector<256x128xbf16>
    %c0_16 = arith.constant 0 : index
    %c896 = arith.constant 896 : index
    %45 = vector.load %arg6[%c0_16, %c896] : memref<256x1152xbf16, #tpu.memory_space<vmem>>, vector<256x128xbf16>
    tpu.vector_store %arg6[%c0_16, %c896], %44 {strides = array<i32>} : memref<256x1152xbf16, #tpu.memory_space<vmem>>, vector<256x128xbf16>,
    %46 = vector.extract_strided_slice %37 {offsets = [0, 2, 0], sizes = [16, 16, 128], strides = [1, 1, 1]} : vector<16x18x128xf32> to vector<16x16x128xf32>
    %47 = vector.shape_cast %46 : vector<16x16x128xf32> to vector<256x128xf32>
    %48 = arith.truncf %47 : vector<256x128xf32> to vector<256x128xbf16>
    %c0_17 = arith.constant 0 : index
    %c1024 = arith.constant 1024 : index
    %49 = vector.load %arg6[%c0_17, %c1024] : memref<256x1152xbf16, #tpu.memory_space<vmem>>, vector<256x128xbf16>
    tpu.vector_store %arg6[%c0_17, %c1024], %48 {strides = array<i32>} : memref<256x1152xbf16, #tpu.memory_space<vmem>>, vector<256x128xbf16>,
    %c0_18 = arith.constant 0 : index
    %c0_19 = arith.constant 0 : index
    %50 = vector.load %arg6[%c0_18, %c0_19] : memref<256x1152xbf16, #tpu.memory_space<vmem>>, vector<256x1152xbf16>
    %c0_20 = arith.constant 0 : index
    %c0_21 = arith.constant 0 : index
    %51 = vector.load %arg3[%c0_20, %c0_21] : memref<1152x128xbf16, #tpu.memory_space<vmem>>, vector<1152x128xbf16>
    %cst = arith.constant dense<0.000000e+00> : vector<256x128xf32>
    %52 = tpu.matmul %50, %51, %cst {dimension_numbers = #tpu.dot_dimension_numbers<[1], [0], [0], [1], [0, 0, 1, 1], [], []>} : vector<256x1152xbf16>, vector<1152x128xbf16>, vector<256x128xf32> -> vector<256x128xf32>
    %c0_22 = arith.constant 0 : index
    %c0_23 = arith.constant 0 : index
    %53 = vector.load %arg4[%c0_22, %c0_23] : memref<1x128xf32, #tpu.memory_space<vmem>>, vector<1x128xf32>
    %54 = vector.broadcast %53 : vector<1x128xf32> to vector<256x128xf32>
    %55 = arith.addf %52, %54 : vector<256x128xf32>
    %cst_24 = arith.constant 0.000000e+00 : f32
    %56 = vector.broadcast %cst_24 : f32 to vector<256x128xf32>
    %57 = arith.maximumf %55, %56 : vector<256x128xf32>
    %c0_25 = arith.constant 0 : index
    %c0_26 = arith.constant 0 : index
    %c0_27 = arith.constant 0 : index
    %58 = vector.load %arg5[%c0_25, %c0_26, %c0_27] : memref<1x256x128xf32, #tpu.memory_space<vmem>>, vector<1x256x128xf32>
    %59 = vector.shape_cast %58 : vector<1x256x128xf32> to vector<256x128xf32>
    %60 = vector.shape_cast %57 : vector<256x128xf32> to vector<1x256x128xf32>
    tpu.vector_store %arg5[%c0_25, %c0_26, %c0_27], %60 {strides = array<i32>} : memref<1x256x128xf32, #tpu.memory_space<vmem>>, vector<1x256x128xf32>,
    return
  }
  func.func @transform_0(%arg0: i32, %arg1: i32) -> (i32, i32, i32, i32) {
    %c0_i32 = arith.constant 0 : i32
    %c0_i32_0 = arith.constant 0 : i32
    %c0_i32_1 = arith.constant 0 : i32
    %c0_i32_2 = arith.constant 0 : i32
    return %arg0, %c0_i32, %c0_i32_0, %c0_i32_1 : i32, i32, i32, i32
  }
  func.func @transform_1(%arg0: i32, %arg1: i32) -> (i32, i32) {
    %c0_i32 = arith.constant 0 : i32
    %c0_i32_0 = arith.constant 0 : i32
    %c0_i32_1 = arith.constant 0 : i32
    return %c0_i32, %c0_i32_0 : i32, i32
  }
  func.func @transform_2(%arg0: i32, %arg1: i32) -> (i32, i32) {
    %c0_i32 = arith.constant 0 : i32
    %c0_i32_0 = arith.constant 0 : i32
    %c0_i32_1 = arith.constant 0 : i32
    return %c0_i32, %c0_i32_0 : i32, i32
  }
  func.func @transform_3(%arg0: i32, %arg1: i32) -> (i32, i32, i32) {
    %c0_i32 = arith.constant 0 : i32
    %c0_i32_0 = arith.constant 0 : i32
    return %arg0, %arg1, %c0_i32 : i32, i32, i32
  }
}

</mosaic_0001>

<bundles_post_ra>
// kernel: tpu_custom_call.1
= control target key start
LH: loop header
LB: loop body
LE: loop exit
PB: predicated region body
PF: predicated region fallthrough
CT: control target
= control target key end

     0   :  { %8 = vsyncpa [#allocation4], 0  ;;  %s6052_s0 = inlined_call_operand.vmem [shape: f32[2,18,18,128], index: 0, kind: input, shape index: {}]   ;;  %s6053_s1 = inlined_call_operand.vmem [shape: bf16[1152,128], index: 1, kind: input, shape index: {}]   ;;  %s6054_s2 = inlined_call_operand.vmem [shape: f32[1,128], index: 2, kind: input, shape index: {}]   ;;  %s6055_s3 = inlined_call_operand.hbm [shape: f32[2,256,128], index: 3, kind: output, shape index: {}]  }
   0x1   :  { %10 = vsyncpa [#allocation4 + $0x1], 0  ;;  %s4090_s12 = smov 0   ;;  %s4092_s13 = smov 0  }
   0x2   :  { %s4094_s14 = smov 0   ;;  %s4096_s15 = smov 0  }
   0x3   :  { %s4098_s16 = smov 0   ;;  %s4100_s17 = smov 0  }
   0x4 LB: > { %s3139_s18 = sadd.s32 4294967295, %s4065_s17   ;;  %s3140_s19 = sadd.s32 4294967294, %s4065_s17   ;;  %s4065_s17 = sphi %s4100_s17, %s16_s17   ;;  %s4061_s16 = sphi %s4098_s16, %s6168_s16   ;;  %s4057_s15 = sphi %s4096_s15, %s6167_s15   ;;  %s4053_s14 = sphi %s4094_s14, %s6166_s14   ;;  %s4049_s13 = sphi %s4092_s13, %s6165_s13   ;;  %s4045_s12 = sphi %s4090_s12, %s6164_s12  }
   0x5   : > { %s28_s20 = sadd.s32 1, %s4061_s16  ;;  %s105_s21 = sadd.s32 1, %s4053_s14 }
   0x6   : > { %p30_p0 = scmp.ge.s32.totalorder %s28_s20, 2  ;;  %p115_p1 = scmp.ne.s32.totalorder %s4053_s14, %s4049_s13 }
   0x7   : > { %p116_p2 = scmp.eq.s32.totalorder %s3139_s18, 1  ;;  %p121_p3 = scmp.ne.s32.totalorder %s4049_s13, %s4045_s12 }
   0x8   : > { %s6170_s20 = smov (%p30_p0, %s28_s20), 0  ;;  %p122_p5 = scmp.eq.s32.totalorder %s3140_s19, 1 }
   0x9   : > { %p4130_p4 = por %p116_p2, %p115_p1  ;;  %s100_s23 = ssub.s32 %s4061_s16, %s6170_s20 }
   0xa   : > { %p3143_p6 = scmp.ge.s32.totalorder %s4065_s17, 1  ;;  %p103_p7 = scmp.eq.s32.totalorder %s100_s23, 0 }
   0xb   : > { %p4137_p8 = por %p122_p5, %p121_p3  ;;  %p154_p9 = scmp.lt.s32.totalorder %s4065_s17, 3 }
   0xc   : > { %s4143_s25 = scalar_select %p103_p7, %s4053_s14, %s105_s21  }
   0xd   : > { %p155_p10 = pnand %p3143_p6, %p154_p9 }
   0xf   : > { %158 = sbr.rel (%p155_p10) target bundleno = 573 (0x23d), region = 32 }
  0x16   : > { %v3915_v0 = vld [vmem:[%s6053_s1 + $0x40] sm:$0xff]   ;;  %p178_p11 = scmp.lt.s32.totalorder %s4057_s15, 1  ;;  %v3917_v2 = vld [vmem:[%s6053_s1 + $0x48] sm:$0xff]   ;;  %v3919_v4 = vld [vmem:[%s6053_s1 + $0x50] sm:$0xff]   ;;  %vm316_vm0 = vcmask 1046528   ;;  %vm461_vm1 = vcmask 1045504  }
  0x17   : > { %v3916_v1 = vld [vmem:[%s6053_s1] sm:$0xff]   ;;  %3321 = vmatprep.subr.bf16.mxu0 %v3915_v0  ;;  %3841 = vmatprep.subr.bf16.mxu1 %v3915_v0  ;;  %v3918_v3 = vld [vmem:[%s6053_s1 + $0x8] sm:$0xff]   ;;  %v3920_v5 = vld [vmem:[%s6053_s1 + $0x10] sm:$0xff]   ;;  %s3320_s7 = sshll.u32 %s4057_s15, 12  ;;  %s4067_s19 = smov [#allocation3]  }
  0x18   : > { %3322 = vmatpush3.bf16.msra.mxu0 %v3916_v1  ;;  %3849 = vmatpush3.bf16.msra.mxu1 %v3916_v1  ;;  %s179_s9 = scalar_select %p178_p11, %s4057_s15, 1  ;;  %v3921_v6 = vld [vmem:[%s6053_s1 + $0x58] sm:$0xff]   ;;  %v3923_v8 = vld [vmem:[%s6053_s1 + $0x60] sm:$0xff]   ;;  %v3925_v10 = vld [vmem:[%s6053_s1 + $0x68] sm:$0xff]  }
  0x19   : > { %3323 = vmatprep.subr.bf16.mxu0 %v3917_v2  ;;  %3842 = vmatprep.subr.bf16.mxu1 %v3917_v2  ;;  %v3922_v7 = vld [vmem:[%s6053_s1 + $0x18] sm:$0xff]   ;;  %v3924_v9 = vld [vmem:[%s6053_s1 + $0x20] sm:$0xff]   ;;  %v3926_v22 = vld [vmem:[%s6053_s1 + $0x28] sm:$0xff]   ;;  %s5998_s11 = scalar_lea.hbm %s6055_s3, %s3320_s7 }
  0x1a   : > { %s3857_s21 = smul.u32 432, %s179_s9  ;;  %v3927_v26 = vld [vmem:[%s6053_s1 + $0x70] sm:$0xff]   ;;  %v3929_v32 = vld [vmem:[%s6053_s1 + $0x78] sm:$0xff]   ;;  %v3931_v41 = vld [vmem:[%s6053_s1 + $0xc0] sm:$0xff]  }
  0x1b   : > { %v3928_v31 = vld [vmem:[%s6053_s1 + $0x30] sm:$0xff]   ;;  %v3930_v33 = vld [vmem:[%s6053_s1 + $0x38] sm:$0xff]   ;;  %v3934_v46 = vld [vmem:[%s6053_s1 + $0x140] sm:$0xff]  }
  0x1c   : > { %3324 = vmatpush3.bf16.msra.mxu0 %v3918_v3  ;;  %3850 = vmatpush3.bf16.msra.mxu1 %v3918_v3  ;;  %s4177_s4 = scalar_lea.vmem %s6052_s0, %s3857_s21  ;;  %v3932_v48 = vld [vmem:[%s6053_s1 + $0x80] sm:$0xff]   ;;  %v3933_v53 = vld [vmem:[%s6053_s1 + $0xc8] sm:$0xff]   ;;  %s3991_s21 = sshll.u32 %s4067_s19, 4  ;;  %s3992_s21 = int_to_ptr.vmem [resolvable:$false] %s3991_s21 }
  0x1d   : > { %3325 = vmatprep.subr.bf16.mxu0 %v3919_v4  ;;  %3843 = vmatprep.subr.bf16.mxu1 %v3919_v4  ;;  %v4186_v11 = vld [vmem:[%s4177_s4] sm:$0xff]  ;;  %v4189_v12 = vld [vmem:[%s4177_s4 + $0x8] sm:$0xff]  ;;  %v4192_v13 = vld [vmem:[%s4177_s4 + $0x10] sm:$0x3]  ;;  %s3993_s23 = scalar_lea.vmem %s3992_s21, 8192 }
  0x1e   : > { %v317_v14 = vrot.slane %v4186_v11, 1  ;;  %v318_v15 = vrot.slane %v4189_v12, 1  ;;  %v320_v16 = vrot.slane %v4192_v13, 1  ;;  %v4198_v17 = vld [vmem:[%s4177_s4 + $0x120] sm:$0xff]  ;;  %v4201_v18 = vld [vmem:[%s4177_s4 + $0x128] sm:$0xff]  ;;  %v4229_v34 = vld [vmem:[%s4177_s4 + $0x18] sm:$0xff]  ;;  %v236_v51 = vpack.c.bf16 %v4189_v12, %v4186_v11 }
  0x1f   : > { %v4204_v19 = vld [vmem:[%s4177_s4 + $0x130] sm:$0x3]  ;;  %v377_v20 = vrot.slane %v4198_v17, 1  ;;  %v378_v21 = vrot.slane %v4201_v18, 1  ;;  %v4232_v35 = vld [vmem:[%s4177_s4 + $0x20] sm:$0xff]  ;;  %v322_v37 = vrot.slane %v4229_v34, 1  ;;  %v248_v52 = vpack.c.bf16 %v4201_v18, %v4198_v17 }
  0x20   : > { %3326 = vmatpush3.bf16.msra.mxu0 %v3920_v5  ;;  %3851 = vmatpush3.bf16.msra.mxu1 %v3920_v5  ;;  %v319_v23 = vsel %vm316_vm0, %v317_v14, %v318_v15  ;;  %v321_v24 = vsel %vm316_vm0, %v318_v15, %v320_v16  ;;  %v380_v25 = vrot.slane %v4204_v19, 1  ;;  %v4235_v36 = vld [vmem:[%s4177_s4 + $0x28] sm:$0x3]  ;;  %v4239_v38 = vrot.slane %v4232_v35, 1  ;;  %v4242_v39 = vld [vmem:[%s4177_s4 + $0x138] sm:$0xff]  ;;  %v4245_v40 = vld [vmem:[%s4177_s4 + $0x140] sm:$0xff] }
  0x21   : > { %3327 = vmatprep.subr.bf16.mxu0 %v3921_v6  ;;  %3844 = vmatprep.subr.bf16.mxu1 %v3921_v6  ;;  %v429_v27 = vpack.c.bf16 %v321_v24, %v319_v23  ;;  %v379_v28 = vsel %vm316_vm0, %v377_v20, %v378_v21  ;;  %v325_v42 = vrot.slane %v4235_v36, 1  ;;  %v4252_v43 = vld [vmem:[%s4177_s4 + $0x148] sm:$0x3]  ;;  %v382_v44 = vrot.slane %v4242_v39, 1  ;;  %v3936_v56 = vld [vmem:[%s6053_s1 + $0x100] sm:$0xff]   ;;  %v4282_v57 = vld [vmem:[%s4177_s4 + $0x30] sm:$0xff] }
  0x22   : > { %v381_v29 = vsel %vm316_vm0, %v378_v21, %v380_v25  ;;  %v383_v45 = vrot.slane %v4245_v40, 1  ;;  %v385_v47 = vrot.slane %v4252_v43, 1  ;;  %v4265_v49 = vsel %vm316_vm0, %v322_v37, %v4239_v38  ;;  %v4286_v59 = vld [vmem:[%s4177_s4 + $0x38] sm:$0xff]  ;;  %v4289_v60 = vld [vmem:[%s4177_s4 + $0x40] sm:$0x3]  ;;  %v4293_v62 = vld [vmem:[%s4177_s4 + $0x150] sm:$0xff] }
  0x23   : > { %2203 = vmatprep.mubr.bf16.mxu0 %v429_v27  ;;  %v441_v30 = vpack.c.bf16 %v381_v29, %v379_v28  ;;  %v326_v50 = vsel %vm316_vm0, %v4239_v38, %v325_v42  ;;  %v327_v61 = vrot.slane %v4282_v57, 1  ;;  %v3935_v63 = vld [vmem:[%s6053_s1 + $0x88] sm:$0xff]   ;;  %v4299_v1 = vrot.slane %v4286_v59, 1  ;;  %v4303_v3 = vld [vmem:[%s4177_s4 + $0x158] sm:$0xff]  ;;  %v4306_v4 = vld [vmem:[%s4177_s4 + $0x160] sm:$0x3] }
  0x24   : > { %3328 = vmatpush3.bf16.msra.mxu0 %v3922_v7  ;;  %3852 = vmatpush3.bf16.msra.mxu1 %v3922_v7  ;;  %v384_v54 = vsel %vm316_vm0, %v382_v44, %v383_v45  ;;  %v386_v55 = vsel %vm316_vm0, %v383_v45, %v385_v47  ;;  %v430_v58 = vpack.c.bf16 %v326_v50, %v4265_v49  ;;  %v330_v2 = vrot.slane %v4289_v60, 1  ;;  %v3942_v14 = vld [vmem:[%s6053_s1 + $0x148] sm:$0xff]   ;;  %v3938_v24 = vld [vmem:[%s6053_s1 + $0x90] sm:$0xff]   ;;  %v3939_v27 = vld [vmem:[%s6053_s1 + $0xd8] sm:$0xff]  }
  0x25   : > { %3329 = vmatprep.subr.bf16.mxu0 %v3923_v8  ;;  %3845 = vmatprep.subr.bf16.mxu1 %v3923_v8  ;;  %v442_v0 = vpack.c.bf16 %v386_v55, %v384_v54  ;;  %v387_v5 = vrot.slane %v4293_v62, 1  ;;  %v388_v6 = vrot.slane %v4303_v3, 1  ;;  %v390_v7 = vrot.slane %v4306_v4, 1  ;;  %v3937_v8 = vld [vmem:[%s6053_s1 + $0xd0] sm:$0xff]   ;;  %v3941_v47 = vld [vmem:[%s6053_s1 + $0xe0] sm:$0xff]  }
  0x26   : > { %2299 = vmatprep.mubr.bf16.mxu1 %v441_v30  ;;  %v525_v15 = vrot.slane %v4204_v19, 2  ;;  %v4328_v21 = vpack.c.bf16 %v4232_v35, %v4229_v34  ;;  %v3944_v19 = vld [vmem:[%s6053_s1 + $0x108] sm:$0xff]   ;;  %v522_v23 = vrot.slane %v4198_v17, 2  ;;  %v4348_v29 = vld [vmem:[%s4177_s4 + $0x50] sm:$0xff]  ;;  %v527_v30 = vrot.slane %v4242_v39, 2  ;;  %v3943_v55 = vld [vmem:[%s6053_s1 + $0xa0] sm:$0xff]  }
  0x27   : > { %v389_v16 = vsel %vm316_vm0, %v387_v5, %v388_v6  ;;  %v391_v20 = vsel %vm316_vm0, %v388_v6, %v390_v7  ;;  %v4345_v17 = vld [vmem:[%s4177_s4 + $0x48] sm:$0xff]  ;;  %v4358_v37 = vrot.slane %v4348_v29, 1  ;;  %v4364_v42 = vld [vmem:[%s4177_s4 + $0x170] sm:$0xff]  ;;  %v4669_v5 = vld [vmem:[%s6053_s1 + $0x200] sm:$0xff]  }
  0x28   : > { %3330 = vmatpush3.bf16.msra.mxu0 %v3924_v9  ;;  %3853 = vmatpush3.bf16.msra.mxu1 %v3924_v9  ;;  %v4316_v9 = vsel %vm316_vm0, %v327_v61, %v4299_v1  ;;  %v443_v28 = vpack.c.bf16 %v391_v20, %v389_v16  ;;  %v3945_v6 = vld [vmem:[%s6053_s1 + $0xe8] sm:$0xff]   ;;  %v6056_v16 = vrot.slane %v4303_v3, 2  ;;  %v4672_v54 = vld [vmem:[%s4177_s4 + $0x40] sm:$0x3] }
  0x29   : > { %3331 = vmatprep.subr.bf16.mxu0 %v3925_v10  ;;  %3846 = vmatprep.subr.bf16.mxu1 %v3925_v10  ;;  %6089 = vst [vmem:[#allocation6_spill] sm:$0xff] %v4316_v9  ;;  %v331_v10 = vsel %vm316_vm0, %v4299_v1, %v330_v2  ;;  %v3950_v2 = vld [vmem:[%s6053_s1 + $0x150] sm:$0xff]   ;;  %v4429_v20 = vld [vmem:[%s4177_s4 + $0x68] sm:$0xff] }
  0x2a   : > { %v431_v25 = vpack.c.bf16 %v331_v10, %v4316_v9  ;;  %v3952_v10 = vld [vmem:[%s6053_s1 + $0x110] sm:$0xff]   ;;  %v4751_v9 = vld [vmem:[%s4177_s4 + $0x88] sm:$0x3] }
  0x2b   : > { %6100 = vst [vmem:[#allocation17_spill] sm:$0xff] %v4751_v9 }
  0x2c   : > { %3332 = vmatpush3.bf16.msra.mxu0 %v3926_v22  ;;  %3854 = vmatpush3.bf16.msra.mxu1 %v3926_v22  ;;  %v249_v22 = vpack.c.bf16 %v4245_v40, %v4242_v39  ;;  %v3940_v39 = vld [vmem:[%s6053_s1 + $0x98] sm:$0xff]  }
  0x2d   : > { %3333 = vmatprep.subr.bf16.mxu0 %v3927_v26  ;;  %3847 = vmatprep.subr.bf16.mxu1 %v3927_v26  ;;  %v523_v26 = vrot.slane %v4201_v18, 2  ;;  %v332_v18 = vrot.slane %v4345_v17, 1 }
  0x2f   : > { %v4367_v44 = vsel %vm461_vm1, %v522_v23, %v523_v26  ;;  %v4384_v50 = vsel %vm461_vm1, %v523_v26, %v525_v15  ;;  %v532_v15 = vrot.slane %v4293_v62, 2  ;;  %v3946_v23 = vld [vmem:[%s6053_s1 + $0xa8] sm:$0xff]   ;;  %v4447_v26 = vld [vmem:[%s4177_s4 + $0x78] sm:$0xff] }
  0x30   : > { %3334 = vmatpush3.bf16.msra.mxu0 %v3928_v31  ;;  %3855 = vmatpush3.bf16.msra.mxu1 %v3928_v31  ;;  %v528_v31 = vrot.slane %v4245_v40, 2  ;;  %6090 = vst [vmem:[#allocation7_spill] sm:$0xff] %v4367_v44  ;;  %6091 = vst [vmem:[#allocation8_spill] sm:$0xff] %v4384_v50 }
  0x31   : > { %3335 = vmatprep.subr.bf16.mxu0 %v3929_v32  ;;  %3848 = vmatprep.subr.bf16.mxu1 %v3929_v32  ;;  %v530_v32 = vrot.slane %v4252_v43, 2  ;;  %v4375_v43 = vld [vmem:[%s4177_s4 + $0x178] sm:$0x3] }
  0x33   : > { %v4403_v61 = vsel %vm461_vm1, %v528_v31, %v530_v32  ;;  %v4464_v32 = vld [vmem:[%s4177_s4 + $0x88] sm:$0x3] }
  0x34   : > { %3336 = vmatpush3.bf16.msra.mxu0 %v3930_v33  ;;  %3856 = vmatpush3.bf16.msra.mxu1 %v3930_v33  ;;  %v4354_v33 = vld [vmem:[%s4177_s4 + $0x58] sm:$0x3]  ;;  %6094 = vst [vmem:[#allocation11_spill] sm:$0xff] %v4403_v61  ;;  %v4711_v61 = vld [vmem:[%s4177_s4 + $0xe0] sm:$0xff] }
  0x35   : > { %3433 = vmatprep.subr.bf16.mxu1 %v3931_v41  ;;  %3545 = vmatprep.subr.bf16.mxu0 %v3934_v46  ;;  %v4361_v41 = vld [vmem:[%s4177_s4 + $0x168] sm:$0xff]  ;;  %v335_v40 = vrot.slane %v4354_v33, 1  ;;  %v393_v46 = vrot.slane %v4364_v42, 1 }
  0x36   : > { %v392_v45 = vrot.slane %v4361_v41, 1 }
  0x37   : > { %2204 = vmatmul.mubr.bf16.vlgmr.msra.gmra.mrb[0].mxu0 %v236_v51  ;;  %2300 = vmatmul.mubr.bf16.vlgmr.msra.gmra.mrb[0].mxu1 %v248_v52  ;;  %v4387_v51 = vsel %vm461_vm1, %v527_v30, %v528_v31  ;;  %v4391_v52 = vsel %vm316_vm0, %v332_v18, %v4358_v37  ;;  %v4461_v31 = vld [vmem:[%s4177_s4 + $0x80] sm:$0xff]  ;;  %v3955_v18 = vld [vmem:[%s6053_s1 + $0x158] sm:$0xff]  }
  0x38   : > { %3434 = vmatpush3.bf16.msra.mxu1 %v3932_v48  ;;  %3546 = vmatpush3.bf16.msra.mxu0 %v3936_v56  ;;  %v395_v48 = vrot.slane %v4375_v43, 1  ;;  %6092 = vst [vmem:[#allocation9_spill] sm:$0xff] %v4387_v51  ;;  %6093 = vst [vmem:[#allocation10_spill] sm:$0xff] %v4391_v52  ;;  %v394_v56 = vsel %vm316_vm0, %v392_v45, %v393_v46  ;;  %v251_v45 = vpack.c.bf16 %v4364_v42, %v4361_v41  ;;  %v4708_v51 = vld [vmem:[%s4177_s4 + $0xd8] sm:$0xff] }
  0x39   : > { %3435 = vmatprep.subr.bf16.mxu1 %v3933_v53  ;;  %2211 = vmatprep.mubr.bf16.mxu0 %v430_v58  ;;  %v336_v53 = vsel %vm316_vm0, %v4358_v37, %v335_v40  ;;  %v4474_v40 = vpack.c.bf16 %v4348_v29, %v4345_v17 }
  0x3a   : > { %2307 = vmatprep.mubr.bf16.mxu1 %v442_v0  ;;  %3547 = vmatprep.subr.bf16.mxu0 %v3942_v14  ;;  %v396_v58 = vsel %vm316_vm0, %v393_v46, %v395_v48  ;;  %v250_v0 = vpack.c.bf16 %v4303_v3, %v4293_v62  ;;  %v432_v7 = vpack.c.bf16 %v336_v53, %v4391_v52  ;;  %v4424_v14 = vld [vmem:[%s4177_s4 + $0x60] sm:$0xff]  ;;  %v3947_v62 = vld [vmem:[%s6053_s1 + $0xf0] sm:$0xff]   ;;  %v462_v46 = vrot.slane %v4186_v11, 2 }
  0x3b   : > { %v465_v48 = vrot.slane %v4192_v13, 2  ;;  %v3948_v53 = vld [vmem:[%s6053_s1 + $0xb0] sm:$0xff]   ;;  %v342_v11 = vrot.slane %v4447_v26, 1  ;;  %v345_v13 = vrot.slane %v4464_v32, 1 }
  0x3c   : > { %3436 = vmatpush3.bf16.msra.mxu1 %v3935_v63  ;;  %3548 = vmatpush3.bf16.msra.mxu0 %v3944_v19  ;;  %v4407_v63 = vpack.c.bf16 %v4286_v59, %v4282_v57  ;;  %v337_v19 = vrot.slane %v4424_v14, 1 }
  0x3d   : > { %3437 = vmatprep.subr.bf16.mxu1 %v3937_v8  ;;  %v444_v8 = vpack.c.bf16 %v396_v58, %v394_v56  ;;  %3549 = vmatprep.subr.bf16.mxu0 %v3950_v2  ;;  %v3949_v56 = vld [vmem:[%s6053_s1 + $0xf8] sm:$0xff]  }
  0x3e   : > { %v3951_v58 = vld [vmem:[%s6053_s1 + $0xb8] sm:$0xff]  }
  0x3f   : > { %2212 = vmatmul.mubr.bf16.gmra.mrb[4].mxu0 %v4328_v21  ;;  %2308 = vmatmul.mubr.bf16.gmra.mrb[4].mxu1 %v249_v22  ;;  %v4432_v22 = vld [vmem:[%s4177_s4 + $0x70] sm:$0x3] }
  0x40   : > { %3438 = vmatpush3.bf16.msra.mxu1 %v3938_v24  ;;  %2219 = vmatprep.mubr.bf16.mxu0 %v431_v25  ;;  %v4443_v24 = vrot.slane %v4429_v20, 1  ;;  %v340_v25 = vrot.slane %v4432_v22, 1 }
  0x41   : > { %3439 = vmatprep.subr.bf16.mxu1 %v3939_v27  ;;  %2315 = vmatprep.mubr.bf16.mxu1 %v443_v28  ;;  %v4452_v27 = vsel %vm461_vm1, %v532_v15, %v6056_v16  ;;  %v3974_v16 = vld [vmem:[%s6053_s1 + $0x1e8] sm:$0xff]  }
  0x42   : > { %6095 = vst [vmem:[#allocation12_spill] sm:$0xff] %v4452_v27  ;;  %v4456_v28 = vsel %vm316_vm0, %v337_v19, %v4443_v24  ;;  %v341_v30 = vsel %vm316_vm0, %v4443_v24, %v340_v25  ;;  %3550 = vmatpush3.bf16.msra.mxu0 %v3952_v10  ;;  %v3953_v10 = vld [vmem:[%s6053_s1 + $0x1c0] sm:$0xff]   ;;  %v4523_v25 = vrot.slane %v4232_v35, 2 }
  0x43   : > { %6096 = vst [vmem:[#allocation13_spill] sm:$0xff] %v4456_v28  ;;  %3551 = vmatprep.subr.bf16.mxu0 %v3955_v18  ;;  %v4531_v18 = vpack.c.bf16 %v4429_v20, %v4424_v14 }
  0x44   : > { %3440 = vmatpush3.bf16.msra.mxu1 %v3940_v39  ;;  %v3956_v39 = vld [vmem:[%s6053_s1 + $0x118] sm:$0xff]  }
  0x45   : > { %3441 = vmatprep.subr.bf16.mxu1 %v3941_v47  ;;  %v463_v47 = vrot.slane %v4189_v12, 2  ;;  %v4490_v12 = vrot.slane %v4461_v31, 1 }
  0x46   : > { %3552 = vmatpush3.bf16.msra.mxu0 %v3956_v39 }
  0x47   : > { %2220 = vmatmul.mubr.bf16.gmra.mrb[8].mxu0 %v4407_v63  ;;  %2316 = vmatmul.mubr.bf16.gmra.mrb[8].mxu1 %v250_v0  ;;  %v3959_v0 = vld [vmem:[%s6053_s1 + $0x160] sm:$0xff]   ;;  %v466_v2 = vsel %vm461_vm1, %v463_v47, %v465_v48  ;;  %v4514_v15 = vsel %vm316_vm0, %v342_v11, %v4490_v12  ;;  %v346_v19 = vsel %vm316_vm0, %v4490_v12, %v345_v13  ;;  %v3957_v48 = vld [vmem:[%s6053_s1 + $0x1c8] sm:$0xff]  }
  0x48   : > { %3442 = vmatpush3.bf16.msra.mxu1 %v3943_v55  ;;  %2227 = vmatprep.mubr.bf16.mxu0 %v432_v7  ;;  %v433_v55 = vpack.c.bf16 %v341_v30, %v4456_v28  ;;  %v4503_v7 = vld [vmem:[%s4177_s4 + $0x90] sm:$0xff]  ;;  %6097 = vst [vmem:[#allocation14_spill] sm:$0xff] %v4514_v15  ;;  %v4527_v30 = vld [vmem:[%s4177_s4 + $0xa0] sm:$0x3]  ;;  %v434_v35 = vpack.c.bf16 %v346_v19, %v4514_v15  ;;  %v886_v19 = vrot.slane %v4282_v57, 2  ;;  %v4794_v28 = vrot.slane %v4461_v31, 2 }
  0x49   : > { %3443 = vmatprep.subr.bf16.mxu1 %v3945_v6  ;;  %2323 = vmatprep.mubr.bf16.mxu1 %v444_v8  ;;  %v464_v6 = vsel %vm461_vm1, %v462_v46, %v463_v47  ;;  %v3960_v8 = vld [vmem:[%s6053_s1 + $0x120] sm:$0xff]   ;;  %v3961_v46 = vld [vmem:[%s6053_s1 + $0x168] sm:$0xff]   ;;  %v350_v47 = vrot.slane %v4527_v30, 1 }
  0x4a   : > { %3553 = vmatprep.subr.bf16.mxu0 %v3959_v0  ;;  %v574_v39 = vpack.c.bf16 %v466_v2, %v464_v6  ;;  %v3962_v0 = vld [vmem:[%s6053_s1 + $0x1d0] sm:$0xff]  }
  0x4b   : > { %3554 = vmatpush3.bf16.msra.mxu0 %v3960_v8  ;;  %v3965_v8 = vld [vmem:[%s6053_s1 + $0x170] sm:$0xff]  }
  0x4c   : > { %3444 = vmatpush3.bf16.msra.mxu1 %v3946_v23  ;;  %v4519_v23 = vld [vmem:[%s4177_s4 + $0x98] sm:$0xff]  ;;  %3555 = vmatprep.subr.bf16.mxu0 %v3961_v46  ;;  %v3964_v46 = vld [vmem:[%s6053_s1 + $0x190] sm:$0xff]  }
  0x4d   : > { %3445 = vmatprep.subr.bf16.mxu1 %v3947_v62  ;;  %v881_v62 = vrot.slane %v4229_v34, 2  ;;  %v347_v34 = vrot.slane %v4503_v7, 1 }
  0x4f   : > { %2228 = vmatmul.mubr.bf16.gmra.mrb[12].mxu0 %v4474_v40  ;;  %2324 = vmatmul.mubr.bf16.gmra.mrb[12].mxu1 %v251_v45  ;;  %v3954_v45 = vld [vmem:[%s6053_s1 + $0x180] sm:$0xff]   ;;  %v4560_v11 = vsel %vm461_vm1, %v881_v62, %v4523_v25  ;;  %v4588_v62 = vrot.slane %v4286_v59, 2 }
  0x50   : > { %3446 = vmatpush3.bf16.msra.mxu1 %v3948_v53  ;;  %2235 = vmatprep.mubr.bf16.mxu0 %v433_v55  ;;  %v3963_v53 = vld [vmem:[%s6053_s1 + $0x128] sm:$0xff]  }
  0x51   : > { %3447 = vmatprep.subr.bf16.mxu1 %v3949_v56  ;;  %2364 = vmatprep.mubr.bf16.mxu1 %v4328_v21  ;;  %v470_v21 = vrot.slane %v4235_v36, 2  ;;  %v4539_v36 = vrot.slane %v4519_v23, 1  ;;  %v3958_v55 = vld [vmem:[%s6053_s1 + $0x188] sm:$0xff]  }
  0x52   : > { %v4556_v56 = vld [vmem:[%s4177_s4 + $0xa8] sm:$0xff]  ;;  %3556 = vmatpush3.bf16.msra.mxu0 %v3963_v53 }
  0x53   : > { %v471_v13 = vsel %vm461_vm1, %v4523_v25, %v470_v21  ;;  %v4573_v2 = vsel %vm316_vm0, %v347_v34, %v4539_v36  ;;  %v351_v6 = vsel %vm316_vm0, %v4539_v36, %v350_v47  ;;  %v4592_v21 = vpack.c.bf16 %v4461_v31, %v4447_v26  ;;  %3557 = vmatprep.subr.bf16.mxu0 %v3965_v8  ;;  %v4606_v47 = vld [vmem:[%s4177_s4 + $0xc0] sm:$0xff]  ;;  %v4614_v53 = vld [vmem:[%s4177_s4 + $0xc8] sm:$0xff]  ;;  %v3980_v31 = vld [vmem:[%s6053_s1 + $0x1f8] sm:$0xff]  }
  0x54   : > { %3448 = vmatpush3.bf16.msra.mxu1 %v3951_v58  ;;  %v4565_v58 = vld [vmem:[%s4177_s4 + $0xb0] sm:$0xff]  ;;  %v475_v34 = vrot.slane %v4289_v60, 2  ;;  %v3967_v60 = vld [vmem:[%s6053_s1 + $0x1d8] sm:$0xff]   ;;  %v4633_v8 = vrot.slane %v4348_v29, 2 }
  0x55   : > { %3657 = vmatprep.subr.bf16.mxu1 %v3953_v10  ;;  %v4581_v10 = vld [vmem:[%s4177_s4 + $0xb8] sm:$0x3]  ;;  %v4599_v57 = vrot.slane %v4565_v58, 1  ;;  %v4735_v44 = vpack.c.bf16 %v4565_v58, %v4556_v56 }
  0x56   : > { %v355_v59 = vrot.slane %v4581_v10, 1 }
  0x57   : > { %2236 = vmatmul.mubr.bf16.gmra.mrb[16].mxu0 %v4531_v18  ;;  %2365 = vmatmul.mubr.bf16.vlgmr.msra.gmra.mrb[16].mxu1 %v574_v39  ;;  %v575_v39 = vpack.c.bf16 %v471_v13, %v4560_v11  ;;  %v3970_v13 = vld [vmem:[%s6053_s1 + $0x138] sm:$0xff]  }
  0x58   : > { %3658 = vmatpush3.bf16.msra.mxu1 %v3954_v45  ;;  %2243 = vmatprep.mubr.bf16.mxu0 %v434_v35  ;;  %v435_v45 = vpack.c.bf16 %v351_v6, %v4573_v2  ;;  %v352_v35 = vrot.slane %v4556_v56, 1  ;;  %v4630_v6 = vld [vmem:[%s4177_s4 + $0xd0] sm:$0x3] }
  0x59   : > { %2372 = vmatprep.mubr.bf16.mxu1 %v4407_v63  ;;  %3659 = vmatprep.subr.bf16.mxu1 %v3957_v48  ;;  %v3966_v63 = vld [vmem:[%s6053_s1 + $0x130] sm:$0xff]   ;;  %v891_v48 = vrot.slane %v4345_v17, 2  ;;  %v476_v17 = vsel %vm461_vm1, %v4588_v62, %v475_v34  ;;  %v4653_v34 = vpack.c.bf16 %v4519_v23, %v4503_v7 }
  0x5a   : > { %3558 = vmatpush3.bf16.msra.mxu0 %v3966_v63  ;;  %v4637_v63 = vsel %vm316_vm0, %v352_v35, %v4599_v57 }
  0x5b   : > { %6098 = vst [vmem:[#allocation15_spill] sm:$0xff] %v4637_v63 }
  0x5c   : > { %3660 = vmatpush3.bf16.msra.mxu1 %v3958_v55  ;;  %v3969_v55 = vld [vmem:[%s6053_s1 + $0x178] sm:$0xff]  }
  0x5d   : > { %3661 = vmatprep.subr.bf16.mxu1 %v3962_v0  ;;  %v4625_v0 = vsel %vm461_vm1, %v886_v19, %v4588_v62  ;;  %3559 = vmatprep.subr.bf16.mxu0 %v3969_v55  ;;  %v4645_v19 = vld [vmem:[%s4177_s4 + $0x28] sm:$0x3]  ;;  %v4660_v55 = vrot.slane %v4614_v53, 1 }
  0x5e   : > { %3560 = vmatpush3.bf16.msra.mxu0 %v3970_v13  ;;  %v740_v29 = vrot.slane %v4645_v19, 1  ;;  %v576_v35 = vpack.c.bf16 %v476_v17, %v4625_v0 }
  0x5f   : > { %2244 = vmatmul.mubr.bf16.gmra.mrb[20].mxu0 %v4592_v21  ;;  %2373 = vmatmul.mubr.bf16.gmra.mrb[20].mxu1 %v575_v39  ;;  %v356_v39 = vsel %vm316_vm0, %v4599_v57, %v355_v59  ;;  %v480_v59 = vrot.slane %v4354_v33, 2  ;;  %v360_v33 = vrot.slane %v4630_v6, 1 }
  0x60   : > { %2251 = vmatprep.mubr.bf16.mxu0 %v435_v45  ;;  %2380 = vmatprep.mubr.bf16.mxu1 %v4474_v40  ;;  %v3968_v40 = vld [vmem:[%s6053_s1 + $0x198] sm:$0xff]   ;;  %v3971_v45 = vld [vmem:[%s6053_s1 + $0x1e0] sm:$0xff]   ;;  %v4664_v13 = vsel %vm316_vm0, %v4239_v38, %v740_v29  ;;  %v745_v29 = vrot.slane %v4672_v54, 1 }
  0x61   : > { %3662 = vmatpush3.bf16.msra.mxu1 %v3964_v46  ;;  %v357_v46 = vrot.slane %v4606_v47, 1  ;;  %v4681_v38 = vld [vmem:[%s4177_s4 + $0x58] sm:$0x3]  ;;  %3793 = vmatprep.subr.bf16.mxu0 %v4669_v5  ;;  %v481_v17 = vsel %vm461_vm1, %v4633_v8, %v480_v59  ;;  %v361_v59 = vsel %vm316_vm0, %v4660_v55, %v360_v33 }
  0x62   : > { %3663 = vmatprep.subr.bf16.mxu1 %v3967_v60  ;;  %v436_v60 = vpack.c.bf16 %v356_v39, %v4637_v63  ;;  %v3972_v39 = vld [vmem:[%s6053_s1 + $0x1a0] sm:$0xff]  }
  0x65   : > { %3664 = vmatpush3.bf16.msra.mxu1 %v3968_v40  ;;  %v4688_v40 = vsel %vm461_vm1, %v891_v48, %v4633_v8  ;;  %v4703_v48 = vsel %vm316_vm0, %v357_v46, %v4660_v55 }
  0x66   : > { %3665 = vmatprep.subr.bf16.mxu1 %v3971_v45  ;;  %v4698_v45 = vsel %vm316_vm0, %v4299_v1, %v745_v29  ;;  %v3975_v1 = vld [vmem:[%s6053_s1 + $0x1a8] sm:$0xff]   ;;  %v577_v46 = vpack.c.bf16 %v481_v17, %v4688_v40  ;;  %v3978_v17 = vld [vmem:[%s6053_s1 + $0x1b0] sm:$0xff]  }
  0x67   : > { %2252 = vmatmul.mubr.bf16.gmra.mrb[24].mxu0 %v4653_v34  ;;  %2381 = vmatmul.mubr.bf16.gmra.mrb[24].mxu1 %v576_v35  ;;  %v750_v35 = vrot.slane %v4681_v38, 1  ;;  %v4721_v29 = vld [vmem:[%s4177_s4 + $0xe8] sm:$0x3] }
  0x68   : > { %2259 = vmatprep.mubr.bf16.mxu0 %v436_v60  ;;  %2388 = vmatprep.mubr.bf16.mxu1 %v4531_v18  ;;  %v896_v60 = vrot.slane %v4424_v14, 2  ;;  %v4731_v18 = vrot.slane %v4429_v20, 2  ;;  %v485_v14 = vrot.slane %v4432_v22, 2  ;;  %v4746_v20 = vrot.slane %v4711_v61, 1 }
  0x69   : > { %3666 = vmatpush3.bf16.msra.mxu1 %v3972_v39  ;;  %v4725_v33 = vsel %vm316_vm0, %v4358_v37, %v750_v35  ;;  %v4728_v39 = vld [vmem:[%s4177_s4 + $0x70] sm:$0x3]  ;;  %v362_v35 = vrot.slane %v4708_v51, 1  ;;  %v365_v22 = vrot.slane %v4721_v29, 1 }
  0x6a   : > { %6099 = vst [vmem:[#allocation16_spill] sm:$0xff] %v4725_v33  ;;  %3667 = vmatprep.subr.bf16.mxu1 %v3974_v16  ;;  %v3977_v37 = vld [vmem:[%s6053_s1 + $0x1f0] sm:$0xff]   ;;  %v437_v16 = vpack.c.bf16 %v361_v59, %v4703_v48  ;;  %v755_v50 = vrot.slane %v4728_v39, 1  ;;  %v4766_v52 = vsel %vm461_vm1, %v896_v60, %v4731_v18  ;;  %v4775_v33 = vld [vmem:[%s4177_s4 + $0xa0] sm:$0x3]  ;;  %v4785_v60 = vld [vmem:[%s4177_s4 + $0xf8] sm:$0xff] }
  0x6b   : > { %6102 = vst [vmem:[#allocation19_spill] sm:$0xff] %v4766_v52  ;;  %6103 = vst [vmem:[#allocation20_spill] sm:$0xff] %v4775_v33 }
  0x6c   : > { %v4758_v59 = vsel %vm316_vm0, %v4443_v24, %v755_v50  ;;  %v486_v50 = vsel %vm461_vm1, %v4731_v18, %v485_v14  ;;  %v4771_v24 = vld [vmem:[%s4177_s4 + $0xf0] sm:$0xff]  ;;  %v4791_v14 = vld [vmem:[%s4177_s4 + $0xb8] sm:$0x3] }
  0x6d   : > { %3668 = vmatpush3.bf16.msra.mxu1 %v3975_v1  ;;  %6101 = vst [vmem:[#allocation18_spill] sm:$0xff] %v4758_v59  ;;  %v4788_v1 = vld [vmem:[%s4177_s4 + $0x100] sm:$0x3]  ;;  %v4803_v59 = vpack.c.bf16 %v4614_v53, %v4606_v47 }
  0x6e   : > { %3669 = vmatprep.subr.bf16.mxu1 %v3977_v37  ;;  %v760_v37 = vrot.slane %v4751_v9, 1  ;;  %v490_v9 = vrot.slane %v4464_v32, 2 }
  0x6f   : > { %2260 = vmatmul.mubr.bf16.gmra.mrb[28].mxu0 %v4735_v44  ;;  %2389 = vmatmul.mubr.bf16.gmra.mrb[28].mxu1 %v577_v46  ;;  %v901_v46 = vrot.slane %v4447_v26, 2 }
  0x70   : > { %2267 = vmatprep.mubr.bf16.mxu0 %v437_v16  ;;  %2396 = vmatprep.mubr.bf16.mxu1 %v4592_v21  ;;  %v4780_v16 = vsel %vm316_vm0, %v362_v35, %v4746_v20  ;;  %v366_v21 = vsel %vm316_vm0, %v4746_v20, %v365_v22  ;;  %v4798_v26 = vsel %vm316_vm0, %v4490_v12, %v760_v37  ;;  %v765_v35 = vrot.slane %v4775_v33, 1  ;;  %v3981_v12 = vld [vmem:[%s6053_s1 + $0x1b8] sm:$0xff]  }
  0x71   : > { %6104 = vst [vmem:[#allocation21_spill] sm:$0xff] %v4780_v16  ;;  %3670 = vmatpush3.bf16.msra.mxu1 %v3978_v17  ;;  %6105 = vst [vmem:[#allocation22_spill] sm:$0xff] %v4798_v26  ;;  %v578_v22 = vpack.c.bf16 %v486_v50, %v4766_v52  ;;  %v438_v37 = vpack.c.bf16 %v366_v21, %v4780_v16  ;;  %v367_v33 = vrot.slane %v4771_v24, 1  ;;  %v4818_v50 = vrot.slane %v4785_v60, 1 }
  0x72   : > { %v4822_v32 = vsel %vm316_vm0, %v4539_v36, %v765_v35  ;;  %v370_v17 = vrot.slane %v4788_v1, 1  ;;  %v535_v26 = vrot.slane %v4306_v4, 2  ;;  %3671 = vmatprep.subr.bf16.mxu1 %v3980_v31  ;;  %v770_v21 = vrot.slane %v4791_v14, 1  ;;  %v4842_v31 = vld [vmem:[%s4177_s4 + $0xd0] sm:$0x3] }
  0x73   : > { %v4832_v52 = vsel %vm461_vm1, %v901_v46, %v4794_v28  ;;  %v491_v36 = vsel %vm461_vm1, %v4794_v28, %v490_v9  ;;  %v6106_v35 = vrot.slane %v4303_v3, 2  ;;  %v4848_v46 = vsel %vm316_vm0, %v367_v33, %v4818_v50  ;;  %v4872_v9 = vld [vmem:[%s4177_s4 + $0x118] sm:$0x3] }
  0x74   : > { %v4854_v3 = vsel %vm316_vm0, %v4599_v57, %v770_v21  ;;  %v538_v33 = vrot.slane %v4364_v42, 2  ;;  %v540_v57 = vrot.slane %v4375_v43, 2  ;;  %v245_v21 = vpack.c.bf16 %v4711_v61, %v4708_v51 }
  0x75   : > { %3672 = vmatpush3.bf16.msra.mxu1 %v3981_v12  ;;  %v4839_v4 = vsel %vm461_vm1, %v6106_v35, %v535_v26  ;;  %v906_v12 = vrot.slane %v4503_v7, 2  ;;  %6107 = vst [vmem:[#allocation23_spill] sm:$0xff] %v4854_v3  ;;  %v371_v26 = vsel %vm316_vm0, %v4818_v50, %v370_v17  ;;  %v4869_v35 = vld [vmem:[%s4177_s4 + $0x110] sm:$0xff]  ;;  %v775_v17 = vrot.slane %v4842_v31, 1 }
  0x76   : > { %v579_v7 = vpack.c.bf16 %v491_v36, %v4832_v52  ;;  %v439_v15 = vpack.c.bf16 %v371_v26, %v4848_v46  ;;  %v4889_v43 = vsel %vm461_vm1, %v538_v33, %v540_v57  ;;  %v373_v36 = vrot.slane %v4869_v35, 1 }
  0x77   : > { %2268 = vmatmul.mubr.bf16.gmra.mrb[32].mxu0 %v4803_v59  ;;  %2397 = vmatmul.mubr.bf16.gmra.mrb[32].mxu1 %v578_v22  ;;  %v4859_v22 = vld [vmem:[%s4177_s4 + $0x108] sm:$0xff]  ;;  %v4893_v3 = vsel %vm316_vm0, %v4660_v55, %v775_v17 }
  0x78   : > { %2275 = vmatprep.mubr.bf16.mxu0 %v438_v37  ;;  %2404 = vmatprep.mubr.bf16.mxu1 %v4653_v34  ;;  %v537_v34 = vrot.slane %v4361_v41, 2  ;;  %v4866_v37 = vrot.slane %v4519_v23, 2  ;;  %v495_v41 = vrot.slane %v4527_v30, 2  ;;  %v4884_v23 = vld [vmem:[%s4177_s4 + $0xe8] sm:$0x3]  ;;  %v372_v63 = vrot.slane %v4859_v22, 1 }
  0x79   : > { %v375_v30 = vrot.slane %v4872_v9, 1  ;;  %v780_v27 = vrot.slane %v4884_v23, 1 }
  0x7a   : > { %v4881_v42 = vsel %vm461_vm1, %v537_v34, %v538_v33  ;;  %v4903_v33 = vld [vmem:[%s4177_s4 + $0x100] sm:$0x3]  ;;  %v4908_v55 = vsel %vm461_vm1, %v906_v12, %v4866_v37  ;;  %v496_v57 = vsel %vm461_vm1, %v4866_v37, %v495_v41  ;;  %v4917_v26 = vsel %vm316_vm0, %v372_v63, %v373_v36 }
  0x7b   : > { %v4914_v17 = vsel %vm316_vm0, %v4746_v20, %v780_v27  ;;  %v785_v12 = vrot.slane %v4903_v33, 1  ;;  %v911_v34 = vrot.slane %v4556_v56, 2  ;;  %v4928_v41 = vrot.slane %v4565_v58, 2 }
  0x7c   : > { %6108 = vst [vmem:[#allocation24_spill] sm:$0xff] %v4914_v17  ;;  %v246_v27 = vpack.c.bf16 %v4785_v60, %v4771_v24  ;;  %v580_v63 = vpack.c.bf16 %v496_v57, %v4908_v55  ;;  %v884_v56 = vrot.slane %v4645_v19, 2 }
  0x7f   : > { %2276 = vmatmul.mubr.bf16.gmra.mrb[36].mxu0 %v245_v21  ;;  %2405 = vmatmul.mubr.bf16.gmra.mrb[36].mxu1 %v579_v7  ;;  %v376_v7 = vsel %vm316_vm0, %v373_v36, %v375_v30  ;;  %v500_v30 = vrot.slane %v4581_v10, 2  ;;  %v4951_v10 = vsel %vm461_vm1, %v911_v34, %v4928_v41  ;;  %v505_v34 = vrot.slane %v4630_v6, 2 }
  0x80   : > { %2283 = vmatprep.mubr.bf16.mxu0 %v439_v15  ;;  %2412 = vmatprep.mubr.bf16.mxu1 %v4735_v44  ;;  %v4923_v44 = vld [vmem:[%s4177_s4 + $0x118] sm:$0x3]  ;;  %v440_v20 = vpack.c.bf16 %v376_v7, %v4917_v26  ;;  %v4937_v15 = vsel %vm316_vm0, %v4818_v50, %v785_v12  ;;  %v885_v50 = vsel %vm461_vm1, %v4523_v25, %v884_v56  ;;  %v916_v7 = vrot.slane %v4606_v47, 2 }
  0x81   : > { %v790_v16 = vrot.slane %v4923_v44, 1  ;;  %v858_v58 = vpack.c.bf16 %v4937_v15, %v4848_v46  ;;  %v501_v19 = vsel %vm461_vm1, %v4928_v41, %v500_v30  ;;  %v4962_v12 = vrot.slane %v4614_v53, 2  ;;  %v5258_v46 = vld [vmem:[%s4177_s4 + $0xa0] sm:$0x3] }
  0x82   : > { %v921_v6 = vrot.slane %v4708_v51, 2  ;;  %v894_v30 = vrot.slane %v4681_v38, 2  ;;  %v6109_v51 = vpack.c.bf16 %v4664_v13, %v4265_v49  ;;  %v3979_v38 = vld [vmem:[%s6053_s1 + $0x210] sm:$0xff]   ;;  %v5008_v13 = vld [vmem:[%s4177_s4 + $0x40] sm:$0x3] }
  0x83   : > { %v4944_v17 = vsel %vm316_vm0, %v373_v36, %v790_v16  ;;  %v247_v16 = vpack.c.bf16 %v4869_v35, %v4859_v22  ;;  %v581_v36 = vpack.c.bf16 %v501_v19, %v4951_v10  ;;  %v4969_v25 = vsel %vm461_vm1, %v916_v7, %v4962_v12  ;;  %v5002_v49 = vld [vmem:[%s4177_s4 + $0x30] sm:$0xff] }
  0x84   : > { %v859_v57 = vpack.c.bf16 %v4944_v17, %v4917_v26  ;;  %v506_v47 = vsel %vm461_vm1, %v4962_v12, %v505_v34  ;;  %v1303_v19 = vrot.slane %v5008_v13, 2 }
  0x87   : > { %2284 = vmatmul.mubr.bf16.gmra.mrb[40].mxu0 %v246_v27  ;;  %2413 = vmatmul.mubr.bf16.gmra.mrb[40].mxu1 %v580_v63  ;;  %v889_v63 = vrot.slane %v4672_v54, 2  ;;  %v4978_v54 = vrot.slane %v4711_v61, 2 }
  0x88   : > { %2291 = vmatprep.mubr.bf16.mxu0 %v440_v20  ;;  %2420 = vmatprep.mubr.bf16.mxu1 %v4803_v59  ;;  %v993_v59 = vpack.c.bf16 %v885_v50, %v4560_v11  ;;  %v582_v11 = vpack.c.bf16 %v506_v47, %v4969_v25  ;;  %v926_v50 = vrot.slane %v4771_v24, 2  ;;  %v899_v24 = vrot.slane %v4728_v39, 2 }
  0x89   : > { %v890_v53 = vsel %vm461_vm1, %v4588_v62, %v889_v63  ;;  %v3976_v62 = vld [vmem:[%s6053_s1 + $0x208] sm:$0xff]   ;;  %v4992_v61 = vsel %vm461_vm1, %v921_v6, %v4978_v54 }
  0x8a   : > { %v994_v20 = vpack.c.bf16 %v890_v53, %v4625_v0  ;;  %v5045_v6 = vld [vmem:[%s4177_s4 + $0x128] sm:$0xff] }
  0x8f   : > { %2292 = vmatmul.mubr.bf16.gmra.mrb[44].mxu0 %v247_v16  ;;  %2421 = vmatmul.mubr.bf16.gmra.mrb[44].mxu1 %v581_v36  ;;  %v5015_v36 = vrot.slane %v4785_v60, 2 }
  0x90   : > { %2428 = vmatprep.mubr.bf16.mxu1 %v245_v21  ;;  %2525 = vmatprep.mubr.bf16.mxu0 %v993_v59  ;;  %v510_v21 = vrot.slane %v4721_v29, 2  ;;  %v895_v29 = vsel %vm461_vm1, %v4633_v8, %v894_v30  ;;  %v515_v59 = vrot.slane %v4788_v1, 2  ;;  %v6110_v1 = vld [vmem:[#allocation6_spill] sm:$0xff]  ;;  %v5055_v30 = vrot.slane %v4869_v35, 2 }
  0x91   : > { %v995_v7 = vpack.c.bf16 %v895_v29, %v4688_v40  ;;  %v3982_v40 = vld [vmem:[%s6053_s1 + $0x218] sm:$0xff]   ;;  %v6111_v47 = vpack.c.bf16 %v4698_v45, %v6110_v1  ;;  %v5037_v53 = vsel %vm461_vm1, %v926_v50, %v5015_v36  ;;  %v3983_v45 = vld [vmem:[%s6053_s1 + $0x220] sm:$0xff]  }
  0x92   : > { %v511_v0 = vsel %vm461_vm1, %v4978_v54, %v510_v21  ;;  %v516_v39 = vsel %vm461_vm1, %v5015_v36, %v515_v59  ;;  %v900_v21 = vsel %vm461_vm1, %v4731_v18, %v899_v24  ;;  %v6112_v18 = vld [vmem:[#allocation19_spill] sm:$0xff]  ;;  %v6115_v35 = vld [vmem:[#allocation10_spill] sm:$0xff]  ;;  %v5078_v50 = vld [vmem:[%s4177_s4 + $0x138] sm:$0xff] }
  0x93   : > { %v583_v8 = vpack.c.bf16 %v511_v0, %v4992_v61  ;;  %v520_v0 = vrot.slane %v4872_v9, 2  ;;  %v3985_v59 = vld [vmem:[%s6053_s1 + $0x230] sm:$0xff]  }
  0x95   : > { %v521_v9 = vsel %vm461_vm1, %v5055_v30, %v520_v0 }
  0x97   : > { %2429 = vmatmul.mubr.bf16.gmra.mrb[48].mxu1 %v582_v11  ;;  %2526 = vmatmul.mubr.bf16.vlgmr.msra.gmra.mrb[48].mxu0 %v6109_v51  ;;  %v5042_v11 = vld [vmem:[%s4177_s4 + $0x120] sm:$0xff]  ;;  %v996_v51 = vpack.c.bf16 %v900_v21, %v6112_v18 }
  0x98   : > { %3794 = vmatpush3.bf16.msra.mxu0 %v4669_v5  ;;  %2436 = vmatprep.mubr.bf16.mxu1 %v246_v27  ;;  %v5005_v5 = vld [vmem:[%s4177_s4 + $0x38] sm:$0xff]  ;;  %v1300_v27 = vrot.slane %v5002_v49, 2  ;;  %v6118_v21 = vld [vmem:[#allocation18_spill] sm:$0xff]  ;;  %v792_v15 = vrot.slane %v5042_v11, 1 }
  0x99   : > { %2533 = vmatprep.mubr.bf16.mxu0 %v994_v20  ;;  %3795 = vmatprep.subr.bf16.mxu0 %v3976_v62  ;;  %v1301_v56 = vrot.slane %v5005_v5, 2  ;;  %v584_v20 = vpack.c.bf16 %v516_v39, %v5037_v53 }
  0x9b   : > { %v5021_v34 = vsel %vm461_vm1, %v1300_v27, %v1301_v56  ;;  %v5024_v63 = vsel %vm461_vm1, %v1301_v56, %v1303_v19  ;;  %v6114_v27 = vld [vmem:[#allocation16_spill] sm:$0xff] }
  0x9c   : > { %3796 = vmatpush3.bf16.msra.mxu0 %v3976_v62  ;;  %v5059_v62 = vpack.c.bf16 %v5045_v6, %v5042_v11  ;;  %v6116_v56 = vpack.c.bf16 %v6114_v27, %v6115_v35  ;;  %v6124_v35 = vld [vmem:[#allocation22_spill] sm:$0xff] }
  0x9d   : > { %3797 = vmatprep.subr.bf16.mxu0 %v3979_v38 }
  0x9f   : > { %2437 = vmatmul.mubr.bf16.gmra.mrb[52].mxu1 %v583_v8  ;;  %2534 = vmatmul.mubr.bf16.gmra.mrb[52].mxu0 %v6111_v47  ;;  %v5081_v8 = vld [vmem:[%s4177_s4 + $0x140] sm:$0xff]  ;;  %v6117_v47 = vld [vmem:[#allocation20_spill] sm:$0xff] }
  0xa0   : > { %2444 = vmatprep.mubr.bf16.mxu1 %v247_v16  ;;  %2541 = vmatprep.mubr.bf16.mxu0 %v995_v7  ;;  %v931_v16 = vrot.slane %v4859_v22, 2  ;;  %v3984_v22 = vld [vmem:[%s6053_s1 + $0x228] sm:$0xff]   ;;  %v909_v39 = vrot.slane %v6117_v47, 2  ;;  %v6129_v47 = vld [vmem:[#allocation9_spill] sm:$0xff] }
  0xa1   : > { %3798 = vmatpush3.bf16.msra.mxu0 %v3979_v38  ;;  %v6113_v38 = vld [vmem:[#allocation17_spill] sm:$0xff] }
  0xa2   : > { %3799 = vmatprep.subr.bf16.mxu0 %v3982_v40  ;;  %v904_v29 = vrot.slane %v6113_v38, 2  ;;  %v5073_v19 = vsel %vm461_vm1, %v931_v16, %v5055_v30  ;;  %v910_v18 = vsel %vm461_vm1, %v4866_v37, %v909_v39  ;;  %v914_v38 = vrot.slane %v4791_v14, 2 }
  0xa3   : > { %v585_v24 = vpack.c.bf16 %v521_v9, %v5073_v19  ;;  %v998_v0 = vpack.c.bf16 %v910_v18, %v4908_v55  ;;  %v5124_v9 = vld [vmem:[%s4177_s4 + $0x168] sm:$0xff]  ;;  %v1159_v18 = vrot.slane %v5008_v13, 1  ;;  %v5176_v13 = vld [vmem:[%s4177_s4 + $0x50] sm:$0xff] }
  0xa4   : > { %v905_v7 = vsel %vm461_vm1, %v4794_v28, %v904_v29  ;;  %v3986_v28 = vld [vmem:[%s6053_s1 + $0x238] sm:$0xff]   ;;  %v6121_v29 = vld [vmem:[#allocation8_spill] sm:$0xff]  ;;  %v915_v14 = vsel %vm461_vm1, %v4928_v41, %v914_v38  ;;  %v5145_v41 = vld [vmem:[%s4177_s4 + $0x180] sm:$0xff] }
  0xa5   : > { %3800 = vmatpush3.bf16.msra.mxu0 %v3982_v40  ;;  %v5091_v40 = vpack.c.bf16 %v5081_v8, %v5078_v50  ;;  %v997_v1 = vpack.c.bf16 %v905_v7, %v4832_v52  ;;  %v5106_v52 = vld [vmem:[%s4177_s4 + $0x158] sm:$0xff]  ;;  %v5127_v7 = vld [vmem:[%s4177_s4 + $0x170] sm:$0xff] }
  0xa6   : > { %3801 = vmatprep.subr.bf16.mxu0 %v3983_v45  ;;  %v5133_v55 = vpack.c.bf16 %v5127_v7, %v5124_v9 }
  0xa7   : > { %2445 = vmatmul.mubr.bf16.gmra.mrb[56].mxu1 %v584_v20  ;;  %2542 = vmatmul.mubr.bf16.gmra.mrb[56].mxu0 %v6116_v56  ;;  %v5103_v20 = vld [vmem:[%s4177_s4 + $0x150] sm:$0xff]  ;;  %v6125_v56 = vld [vmem:[#allocation14_spill] sm:$0xff] }
  0xa8   : > { %2452 = vmatprep.mubr.bf16.mxu1 %v5059_v62  ;;  %2549 = vmatprep.mubr.bf16.mxu0 %v996_v51  ;;  %v5112_v51 = vpack.c.bf16 %v5106_v52, %v5103_v20  ;;  %v6126_v37 = vpack.c.bf16 %v6124_v35, %v6125_v56  ;;  %6127 = vst [vmem:[#allocation6_spill] sm:$0xff] %v5133_v55  ;;  %v5173_v35 = vld [vmem:[%s4177_s4 + $0x48] sm:$0xff] }
  0xa9   : > { %3802 = vmatpush3.bf16.msra.mxu0 %v3983_v45  ;;  %v6119_v45 = vld [vmem:[#allocation13_spill] sm:$0xff] }
  0xaa   : > { %3803 = vmatprep.subr.bf16.mxu0 %v3984_v22  ;;  %v6120_v16 = vpack.c.bf16 %v6118_v21, %v6119_v45  ;;  %v5148_v21 = vld [vmem:[%s4177_s4 + $0x188] sm:$0xff]  ;;  %v1156_v45 = vrot.slane %v5002_v49, 1 }
  0xad   : > { %3804 = vmatpush3.bf16.msra.mxu0 %v3984_v22  ;;  %v6122_v22 = vld [vmem:[#allocation7_spill] sm:$0xff] }
  0xae   : > { %3805 = vmatprep.subr.bf16.mxu0 %v3985_v59  ;;  %v6123_v27 = vpack.c.bf16 %v6121_v29, %v6122_v22  ;;  %v6136_v29 = vld [vmem:[#allocation15_spill] sm:$0xff] }
  0xaf   : > { %2453 = vmatmul.mubr.bf16.gmra.mrb[60].mxu1 %v585_v24  ;;  %2550 = vmatmul.mubr.bf16.gmra.mrb[60].mxu0 %v6120_v16  ;;  %v919_v24 = vrot.slane %v4842_v31, 2  ;;  %v1157_v16 = vrot.slane %v5005_v5, 1 }
  0xb0   : > { %2460 = vmatprep.mubr.bf16.mxu1 %v5091_v40  ;;  %2557 = vmatprep.mubr.bf16.mxu0 %v997_v1  ;;  %v6128_v1 = vld [vmem:[#allocation11_spill] sm:$0xff] }
  0xb1   : > { %3806 = vmatpush3.bf16.msra.mxu0 %v3985_v59  ;;  %v999_v59 = vpack.c.bf16 %v915_v14, %v4951_v10  ;;  %v6130_v39 = vpack.c.bf16 %v6128_v1, %v6129_v47  ;;  %v920_v31 = vsel %vm461_vm1, %v4962_v12, %v919_v24  ;;  %v5154_v10 = vpack.c.bf16 %v5148_v21, %v5145_v41  ;;  %v6135_v12 = vld [vmem:[#allocation23_spill] sm:$0xff] }
  0xb2   : > { %3807 = vmatprep.subr.bf16.mxu0 %v3986_v28  ;;  %v6137_v22 = vpack.c.bf16 %v6135_v12, %v6136_v29  ;;  %v929_v14 = vrot.slane %v4903_v33, 2  ;;  %v6138_v1 = vpack.c.bf16 %v4889_v43, %v4881_v42  ;;  %v6139_v47 = vpack.c.bf16 %v4893_v3, %v4703_v48  ;;  %v5203_v42 = vld [vmem:[%s4177_s4 + $0x70] sm:$0x3]  ;;  %v5224_v12 = vld [vmem:[%s4177_s4 + $0x80] sm:$0xff]  ;;  %v5227_v29 = vld [vmem:[%s4177_s4 + $0x88] sm:$0x3] }
  0xb3   : > { %6132 = vst [vmem:[#allocation19_spill] sm:$0xff] %v5154_v10  ;;  %v1076_v48 = vpack.c.bf16 %v5005_v5, %v5002_v49 }
  0xb5   : > { %3808 = vmatpush3.bf16.msra.mxu0 %v3986_v28  ;;  %v6131_v28 = vpack.c.bf16 %v4822_v32, %v4573_v2  ;;  %v1000_v2 = vpack.c.bf16 %v920_v31, %v4969_v25  ;;  %v924_v32 = vrot.slane %v4884_v23, 2  ;;  %v1158_v25 = vsel %vm316_vm0, %v1156_v45, %v1157_v16  ;;  %v5200_v31 = vld [vmem:[%s4177_s4 + $0x68] sm:$0xff] }
  0xb6   : > { %v1169_v45 = vrot.slane %v5203_v42, 1 }
  0xb7   : > { %2461 = vmatmul.mubr.bf16.gmra.mrb[64].mxu1 %v6123_v27  ;;  %2558 = vmatmul.mubr.bf16.gmra.mrb[64].mxu0 %v6126_v37  ;;  %v925_v23 = vsel %vm461_vm1, %v4978_v54, %v924_v32  ;;  %v1160_v27 = vsel %vm316_vm0, %v1157_v16, %v1159_v18  ;;  %v1161_v54 = vrot.slane %v5173_v35, 1  ;;  %v1167_v32 = vrot.slane %v5200_v31, 1  ;;  %v6140_v16 = vld [vmem:[#allocation24_spill] sm:$0xff]  ;;  %v6141_v18 = vld [vmem:[#allocation21_spill] sm:$0xff] }
  0xb8   : > { %2468 = vmatprep.mubr.bf16.mxu1 %v5112_v51  ;;  %2565 = vmatprep.mubr.bf16.mxu0 %v998_v0  ;;  %v6133_v0 = vld [vmem:[#allocation12_spill] sm:$0xff]  ;;  %v1001_v56 = vpack.c.bf16 %v925_v23, %v4992_v61  ;;  %v1268_v37 = vpack.c.bf16 %v1160_v27, %v1158_v25  ;;  %v930_v61 = vsel %vm461_vm1, %v5015_v36, %v929_v14  ;;  %v934_v36 = vrot.slane %v4923_v44, 2 }
  0xb9   : > { %v6134_v38 = vpack.c.bf16 %v4839_v4, %v6133_v0  ;;  %v5179_v4 = vld [vmem:[%s4177_s4 + $0x58] sm:$0x3]  ;;  %v1002_v3 = vpack.c.bf16 %v930_v61, %v5037_v53  ;;  %v6142_v0 = vpack.c.bf16 %v6140_v16, %v6141_v18  ;;  %v1170_v44 = vsel %vm316_vm0, %v1167_v32, %v1169_v45  ;;  %v3181_v53 = vld [vmem:[%s4177_s4 + $0x130] sm:$0x3]  ;;  %v3184_v61 = vld [vmem:[%s4177_s4 + $0x148] sm:$0x3] }
  0xba   : > { %v1164_v24 = vrot.slane %v5179_v4, 1  ;;  %v935_v49 = vsel %vm461_vm1, %v5055_v30, %v934_v36  ;;  %v936_v23 = vrot.slane %v5042_v11, 2  ;;  %v5233_v25 = vrot.slane %v5045_v6, 2 }
  0xbb   : > { %v1003_v30 = vpack.c.bf16 %v935_v49, %v5073_v19  ;;  %v1172_v14 = vrot.slane %v5224_v12, 1  ;;  %v1179_v45 = vrot.slane %v5258_v46, 1 }
  0xbc   : > { %v5244_v19 = vsel %vm461_vm1, %v936_v23, %v5233_v25  ;;  %v5303_v23 = vrot.slane %v5081_v8, 1 }
  0xbf   : > { %2469 = vmatmul.mubr.bf16.gmra.mrb[68].mxu1 %v6130_v39  ;;  %2566 = vmatmul.mubr.bf16.gmra.mrb[68].mxu0 %v6131_v28  ;;  %v5197_v28 = vld [vmem:[%s4177_s4 + $0x60] sm:$0xff] }
  0xc0   : > { %2476 = vmatprep.mubr.bf16.mxu1 %v5133_v55  ;;  %2573 = vmatprep.mubr.bf16.mxu0 %v999_v59  ;;  %v1162_v59 = vrot.slane %v5176_v13, 1 }
  0xc2   : > { %v1163_v33 = vsel %vm316_vm0, %v1161_v54, %v1162_v59  ;;  %v1165_v39 = vsel %vm316_vm0, %v1162_v59, %v1164_v24  ;;  %v1174_v54 = vrot.slane %v5227_v29, 1 }
  0xc3   : > { %v1269_v43 = vpack.c.bf16 %v1165_v39, %v1163_v33  ;;  %v5255_v33 = vld [vmem:[%s4177_s4 + $0x98] sm:$0xff]  ;;  %v941_v39 = vrot.slane %v5078_v50, 2 }
  0xc7   : > { %2477 = vmatmul.mubr.bf16.gmra.mrb[72].mxu1 %v6134_v38  ;;  %2574 = vmatmul.mubr.bf16.gmra.mrb[72].mxu0 %v6137_v22  ;;  %v5221_v38 = vld [vmem:[%s4177_s4 + $0x78] sm:$0xff]  ;;  %v1077_v22 = vpack.c.bf16 %v5176_v13, %v5173_v35 }
  0xc8   : > { %2484 = vmatprep.mubr.bf16.mxu1 %v5154_v10  ;;  %2581 = vmatprep.mubr.bf16.mxu0 %v1000_v2  ;;  %v1166_v2 = vrot.slane %v5197_v28, 1 }
  0xca   : > { %v1168_v5 = vsel %vm316_vm0, %v1166_v2, %v1167_v32  ;;  %v795_v2 = vrot.slane %v3181_v53, 1  ;;  %v944_v32 = vrot.slane %v3184_v61, 2 }
  0xcb   : > { %v1270_v27 = vpack.c.bf16 %v1170_v44, %v1168_v5  ;;  %v797_v5 = vrot.slane %v5078_v50, 1  ;;  %v5294_v44 = vld [vmem:[%s4177_s4 + $0xa8] sm:$0xff] }
  0xcf   : > { %2485 = vmatmul.mubr.bf16.gmra.mrb[76].mxu1 %v6138_v1  ;;  %2582 = vmatmul.mubr.bf16.gmra.mrb[76].mxu0 %v6139_v47  ;;  %v1175_v1 = vsel %vm316_vm0, %v1172_v14, %v1174_v54  ;;  %v5251_v47 = vld [vmem:[%s4177_s4 + $0x90] sm:$0xff]  ;;  %v800_v54 = vrot.slane %v3184_v61, 1 }
  0xd0   : > { %2589 = vmatprep.mubr.bf16.mxu0 %v1001_v56  ;;  %2686 = vmatprep.mubr.bf16.mxu1 %v1268_v37  ;;  %v939_v56 = vrot.slane %v3181_v53, 2  ;;  %v1171_v37 = vrot.slane %v5221_v38, 1  ;;  %v1176_v11 = vrot.slane %v5251_v47, 1  ;;  %v5297_v53 = vld [vmem:[%s4177_s4 + $0xb0] sm:$0xff] }
  0xd1   : > { %v801_v61 = vsel %vm316_vm0, %v5303_v23, %v800_v54 }
  0xd2   : > { %v940_v59 = vsel %vm461_vm1, %v5233_v25, %v939_v56  ;;  %v1173_v24 = vsel %vm316_vm0, %v1171_v37, %v1172_v14  ;;  %v1079_v56 = vpack.c.bf16 %v5224_v12, %v5221_v38  ;;  %v5310_v37 = vrot.slane %v5106_v52, 2 }
  0xd3   : > { %v1271_v36 = vpack.c.bf16 %v1175_v1, %v1173_v24  ;;  %v1182_v24 = vrot.slane %v5297_v53, 1 }
  0xd4   : > { %6144 = vst [vmem:[#allocation16_spill] sm:$0xff] %v5310_v37 }
  0xd7   : > { %2590 = vmatmul.mubr.bf16.gmra.mrb[80].mxu0 %v6142_v0  ;;  %2687 = vmatmul.mubr.bf16.vlgmr.msra.gmra.mrb[80].mxu1 %v1076_v48  ;;  %v1078_v48 = vpack.c.bf16 %v5200_v31, %v5197_v28 }
  0xd8   : > { %2597 = vmatprep.mubr.bf16.mxu0 %v1002_v3  ;;  %2694 = vmatprep.mubr.bf16.mxu1 %v1269_v43  ;;  %v5268_v3 = vrot.slane %v5081_v8, 2  ;;  %v1004_v43 = vpack.c.bf16 %v940_v59, %v5244_v19  ;;  %v1181_v8 = vrot.slane %v5294_v44, 1 }
  0xda   : > { %v5285_v0 = vsel %vm461_vm1, %v941_v39, %v5268_v3  ;;  %v945_v49 = vsel %vm461_vm1, %v5268_v3, %v944_v32  ;;  %v802_v32 = vrot.slane %v5103_v20, 1 }
  0xdb   : > { %6143 = vst [vmem:[#allocation17_spill] sm:$0xff] %v5285_v0  ;;  %v1005_v50 = vpack.c.bf16 %v945_v49, %v5285_v0  ;;  %v951_v49 = vrot.slane %v5124_v9, 2 }
  0xdf   : > { %2598 = vmatmul.mubr.bf16.gmra.mrb[84].mxu0 %v858_v58  ;;  %2695 = vmatmul.mubr.bf16.gmra.mrb[84].mxu1 %v1077_v22  ;;  %v5262_v58 = vrot.slane %v5045_v6, 1  ;;  %v1177_v6 = vrot.slane %v5255_v33, 1  ;;  %v5300_v22 = vld [vmem:[%s4177_s4 + $0xb8] sm:$0x3] }
  0xe0   : > { %2605 = vmatprep.mubr.bf16.mxu0 %v1003_v30  ;;  %2702 = vmatprep.mubr.bf16.mxu1 %v1270_v27  ;;  %v946_v30 = vrot.slane %v5103_v20, 2  ;;  %v1184_v1 = vrot.slane %v5300_v22, 1 }
  0xe1   : > { %v5279_v16 = vsel %vm316_vm0, %v792_v15, %v5262_v58  ;;  %v796_v18 = vsel %vm316_vm0, %v5262_v58, %v795_v2  ;;  %v1178_v26 = vsel %vm316_vm0, %v1176_v11, %v1177_v6  ;;  %v1180_v17 = vsel %vm316_vm0, %v1177_v6, %v1179_v45  ;;  %v3190_v2 = vld [vmem:[%s4177_s4 + $0x178] sm:$0x3]  ;;  %v5333_v11 = vld [vmem:[%s4177_s4 + $0xc0] sm:$0xff]  ;;  %v5336_v6 = vld [vmem:[%s4177_s4 + $0xc8] sm:$0xff] }
  0xe2   : > { %v860_v27 = vpack.c.bf16 %v796_v18, %v5279_v16  ;;  %v1272_v14 = vpack.c.bf16 %v1180_v17, %v1178_v26  ;;  %v5318_v15 = vsel %vm316_vm0, %v797_v5, %v5303_v23  ;;  %v5324_v39 = vsel %vm461_vm1, %v946_v30, %v5310_v37  ;;  %v5339_v45 = vld [vmem:[%s4177_s4 + $0xd0] sm:$0x3] }
  0xe3   : > { %6145 = vst [vmem:[#allocation10_spill] sm:$0xff] %v5324_v39  ;;  %v5342_v18 = vrot.slane %v5106_v52, 1  ;;  %v861_v26 = vpack.c.bf16 %v801_v61, %v5318_v15  ;;  %v1080_v17 = vpack.c.bf16 %v5255_v33, %v5251_v47  ;;  %v5349_v5 = vrot.slane %v5127_v7, 2  ;;  %v3193_v61 = vld [vmem:[%s4177_s4 + $0x190] sm:$0x3] }
  0xe4   : > { %v1186_v52 = vrot.slane %v5333_v11, 1  ;;  %v1082_v10 = vpack.c.bf16 %v5336_v6, %v5333_v11 }
  0xe5   : > { %6146 = vst [vmem:[#allocation20_spill] sm:$0xff] %v5349_v5  ;;  %v5357_v54 = vsel %vm316_vm0, %v802_v32, %v5342_v18  ;;  %v5378_v32 = vld [vmem:[%s4177_s4 + $0xe8] sm:$0x3] }
  0xe7   : > { %2606 = vmatmul.mubr.bf16.gmra.mrb[88].mxu0 %v859_v57  ;;  %2703 = vmatmul.mubr.bf16.gmra.mrb[88].mxu1 %v1078_v48  ;;  %v3187_v57 = vld [vmem:[%s4177_s4 + $0x160] sm:$0x3] }
  0xe8   : > { %2613 = vmatprep.mubr.bf16.mxu0 %v1004_v43  ;;  %2710 = vmatprep.mubr.bf16.mxu1 %v1271_v36  ;;  %v949_v59 = vrot.slane %v3187_v57, 2  ;;  %v1183_v43 = vsel %vm316_vm0, %v1181_v8, %v1182_v24  ;;  %v1185_v36 = vsel %vm316_vm0, %v1182_v24, %v1184_v1 }
  0xe9   : > { %v1273_v30 = vpack.c.bf16 %v1185_v36, %v1183_v43  ;;  %v5372_v43 = vld [vmem:[%s4177_s4 + $0xd8] sm:$0xff]  ;;  %v5375_v36 = vld [vmem:[%s4177_s4 + $0xe0] sm:$0xff] }
  0xea   : > { %v950_v48 = vsel %vm461_vm1, %v5310_v37, %v949_v59  ;;  %v5363_v59 = vsel %vm461_vm1, %v951_v49, %v5349_v5 }
  0xeb   : > { %v1006_v20 = vpack.c.bf16 %v950_v48, %v5324_v39  ;;  %6147 = vst [vmem:[#allocation18_spill] sm:$0xff] %v5363_v59  ;;  %v807_v48 = vrot.slane %v5124_v9, 1  ;;  %v5388_v9 = vrot.slane %v5148_v21, 2 }
  0xed   : > { %6148 = vst [vmem:[#allocation13_spill] sm:$0xff] %v5388_v9 }
  0xef   : > { %2614 = vmatmul.mubr.bf16.gmra.mrb[92].mxu0 %v860_v27  ;;  %2711 = vmatmul.mubr.bf16.gmra.mrb[92].mxu1 %v1079_v56  ;;  %v805_v27 = vrot.slane %v3187_v57, 1  ;;  %v954_v56 = vrot.slane %v3190_v2, 2 }
  0xf0   : > { %2621 = vmatprep.mubr.bf16.mxu0 %v1005_v50  ;;  %2718 = vmatprep.mubr.bf16.mxu1 %v1272_v14  ;;  %v1187_v50 = vrot.slane %v5336_v6, 1  ;;  %v1189_v14 = vrot.slane %v5339_v45, 1 }
  0xf1   : > { %v806_v57 = vsel %vm316_vm0, %v5342_v18, %v805_v27  ;;  %v955_v8 = vsel %vm461_vm1, %v5349_v5, %v954_v56  ;;  %v5440_v5 = vld [vmem:[%s4177_s4 + $0x110] sm:$0xff] }
  0xf2   : > { %v1188_v24 = vsel %vm316_vm0, %v1186_v52, %v1187_v50  ;;  %v1190_v1 = vsel %vm316_vm0, %v1187_v50, %v1189_v14  ;;  %v862_v49 = vpack.c.bf16 %v806_v57, %v5357_v54  ;;  %v1007_v27 = vpack.c.bf16 %v955_v8, %v5363_v59  ;;  %v5401_v8 = vld [vmem:[%s4177_s4 + $0xf0] sm:$0xff] }
  0xf3   : > { %v1274_v56 = vpack.c.bf16 %v1190_v1, %v1188_v24  ;;  %v959_v52 = vrot.slane %v3193_v61, 2  ;;  %v1192_v50 = vrot.slane %v5375_v36, 1  ;;  %v1194_v14 = vrot.slane %v5378_v32, 1  ;;  %v5404_v24 = vld [vmem:[%s4177_s4 + $0xf8] sm:$0xff]  ;;  %v5407_v1 = vld [vmem:[%s4177_s4 + $0x100] sm:$0x3] }
  0xf7   : > { %2622 = vmatmul.mubr.bf16.gmra.mrb[96].mxu0 %v861_v26  ;;  %2719 = vmatmul.mubr.bf16.gmra.mrb[96].mxu1 %v1080_v17  ;;  %v5381_v26 = vrot.slane %v5127_v7, 1  ;;  %v1081_v17 = vpack.c.bf16 %v5297_v53, %v5294_v44  ;;  %v1191_v7 = vrot.slane %v5372_v43, 1 }
  0xf8   : > { %2629 = vmatprep.mubr.bf16.mxu0 %v1006_v20  ;;  %2726 = vmatprep.mubr.bf16.mxu1 %v1273_v30  ;;  %v810_v20 = vrot.slane %v3190_v2, 1  ;;  %v956_v30 = vrot.slane %v5145_v41, 2 }
  0xf9   : > { %v5396_v2 = vsel %vm316_vm0, %v807_v48, %v5381_v26  ;;  %v1193_v48 = vsel %vm316_vm0, %v1191_v7, %v1192_v50  ;;  %v1197_v7 = vrot.slane %v5404_v24, 1 }
  0xfa   : > { %v811_v57 = vsel %vm316_vm0, %v5381_v26, %v810_v20  ;;  %v5411_v60 = vsel %vm461_vm1, %v956_v30, %v5388_v9  ;;  %v812_v20 = vrot.slane %v5145_v41, 1  ;;  %v815_v30 = vrot.slane %v3193_v61, 1 }
  0xfb   : > { %6149 = vst [vmem:[#allocation8_spill] sm:$0xff] %v5411_v60 }
  0xff   : > { %2630 = vmatmul.mubr.bf16.gmra.mrb[100].mxu0 %v862_v49  ;;  %2727 = vmatmul.mubr.bf16.gmra.mrb[100].mxu1 %v1081_v17  ;;  %v960_v49 = vsel %vm461_vm1, %v5388_v9, %v959_v52  ;;  %v1195_v17 = vsel %vm316_vm0, %v1192_v50, %v1194_v14  ;;  %v1196_v52 = vrot.slane %v5401_v8, 1  ;;  %v1199_v50 = vrot.slane %v5407_v1, 1  ;;  %v5437_v9 = vld [vmem:[%s4177_s4 + $0x108] sm:$0xff] }
 0x100   : > { %2637 = vmatprep.mubr.bf16.mxu0 %v1007_v27  ;;  %2734 = vmatprep.mubr.bf16.mxu1 %v1274_v56  ;;  %v5419_v27 = vrot.slane %v5148_v21, 1  ;;  %v863_v56 = vpack.c.bf16 %v811_v57, %v5396_v2  ;;  %v1008_v41 = vpack.c.bf16 %v960_v49, %v5411_v60  ;;  %v1275_v14 = vpack.c.bf16 %v1195_v17, %v1193_v48  ;;  %v5443_v49 = vld [vmem:[%s4177_s4 + $0x118] sm:$0x3] }
 0x101   : > { %v1198_v61 = vsel %vm316_vm0, %v1196_v52, %v1197_v7  ;;  %v1200_v59 = vsel %vm316_vm0, %v1197_v7, %v1199_v50  ;;  %v1305_v48 = vrot.slane %v5173_v35, 2  ;;  %v1306_v17 = vrot.slane %v5176_v13, 2 }
 0x102   : > { %6150 = vst [vmem:[#allocation7_spill] sm:$0xff] %v5419_v27  ;;  %v5430_v21 = vsel %vm316_vm0, %v812_v20, %v5419_v27  ;;  %v816_v57 = vsel %vm316_vm0, %v5419_v27, %v815_v30  ;;  %v1083_v52 = vpack.c.bf16 %v5375_v36, %v5372_v43  ;;  %v1276_v7 = vpack.c.bf16 %v1200_v59, %v1198_v61 }
 0x103   : > { %6151 = vst [vmem:[#allocation22_spill] sm:$0xff] %v5430_v21  ;;  %v864_v30 = vpack.c.bf16 %v816_v57, %v5430_v21  ;;  %v1202_v60 = vrot.slane %v5440_v5, 1  ;;  %v1204_v35 = vrot.slane %v5443_v49, 1  ;;  %v1310_v13 = vrot.slane %v5197_v28, 2 }
 0x104   : > { %v1311_v21 = vrot.slane %v5200_v31, 2  ;;  %v1313_v59 = vrot.slane %v5203_v42, 2  ;;  %v1307_v28 = vsel %vm461_vm1, %v1305_v48, %v1306_v17  ;;  %v6152_v31 = vpack.c.bf16 %v5024_v63, %v5021_v34 }
 0x105   : > { %v1205_v42 = vsel %vm316_vm0, %v1202_v60, %v1204_v35  ;;  %v1084_v48 = vpack.c.bf16 %v5404_v24, %v5401_v8  ;;  %v1318_v34 = vrot.slane %v5227_v29, 2 }
 0x107   : > { %2638 = vmatmul.mubr.bf16.gmra.mrb[104].mxu0 %v863_v56  ;;  %2735 = vmatmul.mubr.bf16.gmra.mrb[104].mxu1 %v1082_v10  ;;  %v1308_v10 = vrot.slane %v5179_v4, 2 }
 0x108   : > { %2645 = vmatprep.mubr.bf16.mxu0 %v1008_v41  ;;  %2742 = vmatprep.mubr.bf16.mxu1 %v1275_v14  ;;  %v1201_v14 = vrot.slane %v5437_v9, 1 }
 0x10a   : > { %v3409_v20 = vpop.f32.mrb[0].mxu1  ;;  %v3337_v56 = vpop.f32.mrb[0].mxu0 }
 0x10b   : > { %v3410_v50 = vpop.f32.mrb[1].mxu1  ;;  %v3338_v41 = vpop.f32.mrb[1].mxu0 }
 0x10c   : > { %v5455_v55 = vadd.f32 %v3410_v50, %v3409_v20  ;;  %v3412_v4 = vpop.f32.mrb[2].mxu1  ;;  %v5457_v39 = vadd.f32 %v3338_v41, %v3337_v56  ;;  %v3340_v57 = vpop.f32.mrb[2].mxu0  ;;  %v1309_v20 = vsel %vm461_vm1, %v1306_v17, %v1308_v10  ;;  %v1203_v56 = vsel %vm316_vm0, %v1201_v14, %v1202_v60  ;;  %v5475_v41 = vld [vmem:[%s4177_s4 + $0x130] sm:$0x3] }
 0x10d   : > { %v3413_v61 = vpop.f32.mrb[3].mxu1  ;;  %v3341_v0 = vpop.f32.mrb[3].mxu0  ;;  %v1312_v50 = vsel %vm461_vm1, %v1310_v13, %v1311_v21  ;;  %v1413_v10 = vpack.c.bf16 %v1309_v20, %v1307_v28  ;;  %v1277_v14 = vpack.c.bf16 %v1205_v42, %v1203_v56  ;;  %v1320_v13 = vrot.slane %v5251_v47, 2 }
 0x10e   : > { %v5461_v37 = vadd.f32 %v3413_v61, %v3412_v4  ;;  %v5463_v27 = vadd.f32 %v3341_v0, %v3340_v57  ;;  %v1314_v0 = vsel %vm461_vm1, %v1311_v21, %v1313_v59  ;;  %v1209_v21 = vrot.slane %v5475_v41, 1 }
 0x10f   : > { %2646 = vmatmul.mubr.bf16.gmra.mrb[108].mxu0 %v864_v30  ;;  %2743 = vmatmul.mubr.bf16.gmra.mrb[108].mxu1 %v1083_v52  ;;  %v1315_v52 = vrot.slane %v5221_v38, 2  ;;  %v1414_v35 = vpack.c.bf16 %v1314_v0, %v1312_v50  ;;  %v1321_v38 = vrot.slane %v5255_v33, 2  ;;  %v5501_v50 = vld [vmem:[%s4177_s4 + $0x148] sm:$0x3]  ;;  %v1085_v0 = vpack.c.bf16 %v5440_v5, %v5437_v9 }
 0x110   : > { %2750 = vmatprep.mubr.bf16.mxu1 %v1276_v7  ;;  %3809 = vmatprep.mubr.bf16.mxu0 %v6152_v31  ;;  %v1316_v7 = vrot.slane %v5224_v12, 2  ;;  %v1323_v12 = vrot.slane %v5258_v46, 2  ;;  %v1210_v42 = vsel %vm316_vm0, %v5262_v58, %v1209_v21  ;;  %v1326_v58 = vrot.slane %v5297_v53, 2 }
 0x111   : > { %v1322_v33 = vsel %vm461_vm1, %v1320_v13, %v1321_v38 }
 0x112   : > { %v3415_v30 = vpop.f32.mrb[4].mxu1  ;;  %v3343_v17 = vpop.f32.mrb[4].mxu0  ;;  %v1317_v47 = vsel %vm461_vm1, %v1315_v52, %v1316_v7  ;;  %v1319_v31 = vsel %vm461_vm1, %v1316_v7, %v1318_v34  ;;  %v1324_v46 = vsel %vm461_vm1, %v1321_v38, %v1323_v12  ;;  %v1325_v52 = vrot.slane %v5294_v44, 2 }
 0x113   : > { %v3416_v63 = vpop.f32.mrb[5].mxu1  ;;  %v3344_v60 = vpop.f32.mrb[5].mxu0  ;;  %v1333_v44 = vrot.slane %v5339_v45, 2 }
 0x114   : > { %v5484_v4 = vadd.f32 %v3416_v63, %v3415_v30  ;;  %v3418_v57 = vpop.f32.mrb[6].mxu1  ;;  %v5486_v59 = vadd.f32 %v3344_v60, %v3343_v17  ;;  %v3346_v61 = vpop.f32.mrb[6].mxu0  ;;  %v1415_v17 = vpack.c.bf16 %v1319_v31, %v1317_v47  ;;  %v1416_v63 = vpack.c.bf16 %v1324_v46, %v1322_v33  ;;  %v5528_v47 = vld [vmem:[%s4177_s4 + $0x160] sm:$0x3] }
 0x115   : > { %v3419_v29 = vpop.f32.mrb[7].mxu1  ;;  %v3347_v28 = vpop.f32.mrb[7].mxu0  ;;  %v1328_v60 = vrot.slane %v5300_v22, 2  ;;  %v1335_v46 = vrot.slane %v5372_v43, 2  ;;  %v1341_v43 = vrot.slane %v5404_v24, 2 }
 0x116   : > { %v5490_v20 = vadd.f32 %v3419_v29, %v3418_v57  ;;  %v5492_v56 = vadd.f32 %v3347_v28, %v3346_v61 }
 0x117   : > { %2751 = vmatmul.mubr.bf16.gmra.mrb[112].mxu1 %v1084_v48  ;;  %3810 = vmatmul.mubr.bf16.vlgmr.msra.gmra.mrb[112].mxu0 %v1413_v10  ;;  %v1278_v10 = vpack.c.bf16 %v1210_v42, %v5279_v16  ;;  %v1331_v16 = vrot.slane %v5336_v6, 2  ;;  %v1329_v29 = vsel %vm461_vm1, %v1326_v58, %v1328_v60 }
 0x118   : > { %2758 = vmatprep.mubr.bf16.mxu1 %v1277_v14  ;;  %3813 = vmatprep.mubr.bf16.mxu0 %v1414_v35  ;;  %v1214_v14 = vrot.slane %v5501_v50, 1  ;;  %v1330_v35 = vrot.slane %v5333_v11, 2  ;;  %v1327_v11 = vsel %vm461_vm1, %v1325_v52, %v1326_v58  ;;  %v1219_v52 = vrot.slane %v5528_v47, 1 }
 0x119   : > { %v1334_v45 = vsel %vm461_vm1, %v1331_v16, %v1333_v44  ;;  %v1417_v33 = vpack.c.bf16 %v1329_v29, %v1327_v11  ;;  %v1340_v58 = vrot.slane %v5401_v8, 2  ;;  %v1345_v44 = vrot.slane %v5437_v9, 2 }
 0x11a   : > { %v3421_v48 = vpop.f32.mrb[8].mxu1  ;;  %v3349_v30 = vpop.f32.mrb[8].mxu0  ;;  %v1215_v28 = vsel %vm316_vm0, %v5303_v23, %v1214_v14  ;;  %v1332_v6 = vsel %vm461_vm1, %v1330_v35, %v1331_v16  ;;  %v5554_v16 = vld [vmem:[%s4177_s4 + $0x178] sm:$0x3] }
 0x11b   : > { %v3422_v7 = vpop.f32.mrb[9].mxu1  ;;  %v3350_v34 = vpop.f32.mrb[9].mxu0  ;;  %v1418_v23 = vpack.c.bf16 %v1334_v45, %v1332_v6  ;;  %v1342_v24 = vsel %vm461_vm1, %v1340_v58, %v1341_v43 }
 0x11c   : > { %v5511_v21 = vadd.f32 %v3422_v7, %v3421_v48  ;;  %v3424_v13 = vpop.f32.mrb[10].mxu1  ;;  %v5513_v57 = vadd.f32 %v3350_v34, %v3349_v30  ;;  %v3352_v61 = vpop.f32.mrb[10].mxu0  ;;  %v1338_v48 = vrot.slane %v5378_v32, 2 }
 0x11d   : > { %v3425_v53 = vpop.f32.mrb[11].mxu1  ;;  %v3353_v38 = vpop.f32.mrb[11].mxu0 }
 0x11e   : > { %v5517_v12 = vadd.f32 %v3425_v53, %v3424_v13  ;;  %v5519_v22 = vadd.f32 %v3353_v38, %v3352_v61  ;;  %v1220_v61 = vsel %vm316_vm0, %v5342_v18, %v1219_v52  ;;  %v1348_v53 = vrot.slane %v5443_v49, 2  ;;  %v5562_v38 = vld [vmem:[%s6054_s2] ss:$0 sm:$0xff] }
 0x11f   : > { %2759 = vmatmul.mubr.bf16.gmra.mrb[116].mxu1 %v1085_v0  ;;  %3814 = vmatmul.mubr.bf16.gmra.mrb[116].mxu0 %v1415_v17  ;;  %v1336_v0 = vrot.slane %v5375_v36, 2  ;;  %v1343_v36 = vrot.slane %v5407_v1, 2 }
 0x120   : > { %2766 = vmatprep.mubr.bf16.mxu1 %v1278_v10  ;;  %3817 = vmatprep.mubr.bf16.mxu0 %v1416_v63  ;;  %v1279_v10 = vpack.c.bf16 %v1215_v28, %v5318_v15  ;;  %v1280_v28 = vpack.c.bf16 %v1220_v61, %v5357_v54  ;;  %v2214_v61 = vadd.f32 %v5486_v59, %v5562_v38 }
 0x121   : > { %v1337_v8 = vsel %vm461_vm1, %v1335_v46, %v1336_v0  ;;  %v1339_v13 = vsel %vm461_vm1, %v1336_v0, %v1338_v48  ;;  %v1344_v1 = vsel %vm461_vm1, %v1341_v43, %v1343_v36  ;;  %v1353_v0 = vrot.slane %v5475_v41, 2 }
 0x122   : > { %v3427_v31 = vpop.f32.mrb[12].mxu1  ;;  %v3355_v42 = vpop.f32.mrb[12].mxu0  ;;  %v1419_v29 = vpack.c.bf16 %v1339_v13, %v1337_v8 }
 0x123   : > { %v3428_v30 = vpop.f32.mrb[13].mxu1  ;;  %v3356_v17 = vpop.f32.mrb[13].mxu0 }
 0x124   : > { %v5536_v7 = vadd.f32 %v3428_v30, %v3427_v31  ;;  %v3430_v34 = vpop.f32.mrb[14].mxu1  ;;  %v5538_v63 = vadd.f32 %v3356_v17, %v3355_v42  ;;  %v3358_v60 = vpop.f32.mrb[14].mxu0  ;;  %v1420_v31 = vpack.c.bf16 %v1344_v1, %v1342_v24  ;;  %v1224_v42 = vrot.slane %v5554_v16, 1 }
 0x125   : > { %v3431_v32 = vpop.f32.mrb[15].mxu1  ;;  %v3359_v14 = vpop.f32.mrb[15].mxu0 }
 0x126   : > { %v5542_v35 = vadd.f32 %v3431_v32, %v3430_v34  ;;  %v5544_v15 = vadd.f32 %v3359_v14, %v3358_v60  ;;  %v1225_v41 = vsel %vm316_vm0, %v5381_v26, %v1224_v42  ;;  %v1354_v34 = vsel %vm461_vm1, %v5233_v25, %v1353_v0  ;;  %v5587_v60 = vld [vmem:[%s4177_s4 + $0x190] sm:$0x3]  ;;  %v3241_v42 = vld [vmem:[%s4177_s4 + $0x1a8] sm:$0x3] }
 0x127   : > { %2767 = vmatmul.mubr.bf16.gmra.mrb[120].mxu1 %v5059_v62  ;;  %3818 = vmatmul.mubr.bf16.gmra.mrb[120].mxu0 %v1417_v33  ;;  %v1346_v62 = vrot.slane %v5440_v5, 2  ;;  %v2206_v5 = vadd.f32 %v5457_v39, %v5562_v38  ;;  %v1281_v32 = vpack.c.bf16 %v1225_v41, %v5396_v2  ;;  %v1422_v26 = vpack.c.bf16 %v1354_v34, %v5244_v19 }
 0x128   : > { %2774 = vmatprep.mubr.bf16.mxu1 %v1279_v10  ;;  %3821 = vmatprep.mubr.bf16.mxu0 %v1418_v23  ;;  %v2209_v10 = vadd.f32 %v5463_v27, %v5562_v38  ;;  %v1229_v13 = vrot.slane %v5587_v60, 1  ;;  %v2217_v19 = vadd.f32 %v5492_v56, %v5562_v38  ;;  %v2222_v41 = vadd.f32 %v5513_v57, %v5562_v38  ;;  %v6159_v57 = vld [vmem:[#allocation20_spill] sm:$0xff] }
 0x129   : > { %v1347_v54 = vsel %vm461_vm1, %v1345_v44, %v1346_v62  ;;  %v1349_v17 = vsel %vm461_vm1, %v1346_v62, %v1348_v53  ;;  %v1363_v62 = vrot.slane %v5528_v47, 2 }
 0x12a   : > { %v3449_v18 = vpop.f32.mrb[16].mxu1  ;;  %v3361_v11 = vpop.f32.mrb[16].mxu0  ;;  %v1421_v27 = vpack.c.bf16 %v1349_v17, %v1347_v54  ;;  %v6157_v54 = vld [vmem:[#allocation10_spill] sm:$0xff] }
 0x12b   : > { %v3450_v6 = vpop.f32.mrb[17].mxu1  ;;  %v3362_v45 = vpop.f32.mrb[17].mxu0 }
 0x12c   : > { %v3451_v9 = vadd.f32 %v3450_v6, %v3449_v18  ;;  %v3452_v49 = vpop.f32.mrb[18].mxu1  ;;  %v5568_v33 = vadd.f32 %v3362_v45, %v3361_v11  ;;  %v3364_v46 = vpop.f32.mrb[18].mxu0  ;;  %v6154_v6 = vld [vmem:[#allocation16_spill] sm:$0xff]  ;;  %v5614_v45 = vld [vmem:[%s4177_s4 + $0x198] sm:$0xff] }
 0x12d   : > { %v3453_v48 = vpop.f32.mrb[19].mxu1  ;;  %v3365_v30 = vpop.f32.mrb[19].mxu0  ;;  %v1364_v56 = vsel %vm461_vm1, %v6154_v6, %v1363_v62 }
 0x12e   : > { %v5575_v23 = vadd.f32 %v3451_v9, %v2206_v5  ;;  %v3454_v39 = vadd.f32 %v3453_v48, %v3452_v49  ;;  %v5577_v52 = vadd.f32 %v3365_v30, %v3364_v46  ;;  %v6155_v9 = vld [vmem:[#allocation17_spill] sm:$0xff]  ;;  %v6156_v48 = vld [vmem:[#allocation22_spill] sm:$0xff]  ;;  %v1424_v17 = vpack.c.bf16 %v1364_v56, %v6157_v54 }
 0x12f   : > { %2775 = vmatmul.mubr.bf16.gmra.mrb[124].mxu1 %v5091_v40  ;;  %3822 = vmatmul.mubr.bf16.gmra.mrb[124].mxu0 %v1419_v29  ;;  %v1358_v40 = vrot.slane %v5501_v50, 2  ;;  %v6153_v29 = vld [vmem:[#allocation7_spill] sm:$0xff]  ;;  %v1375_v56 = vrot.slane %v5614_v45, 2 }
 0x130   : > { %v5582_v58 = vadd.f32 %v3454_v39, %v2209_v10  ;;  %2782 = vmatprep.mubr.bf16.mxu1 %v1280_v28  ;;  %3825 = vmatprep.mubr.bf16.mxu0 %v1420_v31  ;;  %v1230_v47 = vsel %vm316_vm0, %v6153_v29, %v1229_v13  ;;  %v5617_v31 = vld [vmem:[%s4177_s4 + $0x1a0] sm:$0xff]  ;;  %v1231_v10 = vrot.slane %v5614_v45, 1  ;;  %s175_s4 = sand.u32 1, %s4049_s13  }
 0x131   : > { %v1359_v59 = vsel %vm461_vm1, %v5268_v3, %v1358_v40  ;;  %v1368_v3 = vrot.slane %v5554_v16, 2  ;;  %v1282_v30 = vpack.c.bf16 %v1230_v47, %v6156_v48  ;;  %v1232_v39 = vrot.slane %v5617_v31, 1  ;;  %v6162_v48 = vld [vmem:[#allocation8_spill] sm:$0xff]  ;;  %s3144_s5 = sshll.u32 %s175_s4, 8  ;;  %s6006_s18 = scalar_lea.sflag [#allocation4], %s175_s4 }
 0x132   : > { %v3455_v43 = vpop.f32.mrb[20].mxu1  ;;  %v3367_v36 = vpop.f32.mrb[20].mxu0  ;;  %v1423_v49 = vpack.c.bf16 %v1359_v59, %v6155_v9  ;;  %v2230_v9 = vadd.f32 %v5538_v63, %v5562_v38  ;;  %s5927_s6 = scalar_lea.vmem [#allocation3], %s3144_s5 }
 0x133   : > { %v3456_v14 = vpop.f32.mrb[21].mxu1  ;;  %v3368_v8 = vpop.f32.mrb[21].mxu0  ;;  %s3056_s8 = sshll.u32 %s5927_s6, 4  ;;  %s6000_s8 = int_to_ptr.vmem [resolvable:$true] %s3056_s8 }
 0x134   : > { %v3457_v24 = vadd.f32 %v3456_v14, %v3455_v43  ;;  %v3458_v25 = vpop.f32.mrb[22].mxu1  ;;  %v5595_v1 = vadd.f32 %v3368_v8, %v3367_v36  ;;  %v3370_v44 = vpop.f32.mrb[22].mxu0  ;;  %v1373_v14 = vrot.slane %v5587_v60, 2  ;;  %v2225_v8 = vadd.f32 %v5519_v22, %v5562_v38  ;;  %v6160_v22 = vld [vmem:[#allocation13_spill] sm:$0xff]  ;;  %s3987_s15 = scalar_lea.vmem %s6000_s8, 4096  ;;  %p3994_p1 = scmp.lt.s32.totalorder %s6000_s8, %s3992_s21 }
 0x135   : > { %v3459_v2 = vpop.f32.mrb[23].mxu1  ;;  %v3371_v50 = vpop.f32.mrb[23].mxu0  ;;  %v1233_v60 = vsel %vm316_vm0, %v1231_v10, %v1232_v39  ;;  %v2233_v10 = vadd.f32 %v5544_v15, %v5562_v38  ;;  %p3988_p12 = scmp.ne.s32.totalorder %s6000_s8, %s3987_s15  ;;  %p3995_p2 = scmp.lt.s32.totalorder %s3993_s23, %s3987_s15 }
 0x136   : > { %v5600_v53 = vadd.f32 %v3457_v24, %v2214_v61  ;;  %v3460_v18 = vadd.f32 %v3459_v2, %v3458_v25  ;;  %v5602_v11 = vadd.f32 %v3371_v50, %v3370_v44  ;;  %v6158_v24 = vld [vmem:[#allocation6_spill] sm:$0xff]  ;;  %v1369_v25 = vsel %vm461_vm1, %v6159_v57, %v1368_v3 }
 0x137   : > { %2783 = vmatmul.mubr.bf16.gmra.mrb[128].mxu1 %v5112_v51  ;;  %3826 = vmatmul.mubr.bf16.gmra.mrb[128].mxu0 %v1421_v27  ;;  %v1374_v2 = vsel %vm461_vm1, %v6160_v22, %v1373_v14  ;;  %v1091_v14 = vpack.c.bf16 %v5617_v31, %v5614_v45  ;;  %p3989_p13 = pnand %p3988_p12, %p4130_p4  ;;  %p3996_p3 = por %p3995_p2, %p3994_p1 }
 0x138   : > { %v5609_v28 = vadd.f32 %v3460_v18, %v2217_v19  ;;  %2790 = vmatprep.mubr.bf16.mxu1 %v1281_v32  ;;  %3829 = vmatprep.mubr.bf16.mxu0 %v1422_v26  ;;  %v1234_v32 = vrot.slane %v3241_v42, 1  ;;  %v6161_v18 = vld [vmem:[#allocation18_spill] sm:$0xff] }
 0x139   : > { %v1425_v59 = vpack.c.bf16 %v1369_v25, %v6161_v18  ;;  %p3990_p0 = pneg %p3989_p13 }
 0x13a   : > { %v3461_v51 = vpop.f32.mrb[24].mxu1  ;;  %v3373_v5 = vpop.f32.mrb[24].mxu0  ;;  %v1235_v62 = vsel %vm316_vm0, %v1232_v39, %v1234_v32 }
 0x13b   : > { %v3462_v46 = vpop.f32.mrb[25].mxu1  ;;  %v3374_v0 = vpop.f32.mrb[25].mxu0  ;;  %v1283_v6 = vpack.c.bf16 %v1235_v62, %v1233_v60  ;;  %p3997_p5 = pnand %p3996_p3, %p3990_p0 }
 0x13c   : > { %v3463_v34 = vadd.f32 %v3462_v46, %v3461_v51  ;;  %v3464_v27 = vpop.f32.mrb[26].mxu1  ;;  %v5628_v43 = vadd.f32 %v3374_v0, %v3373_v5  ;;  %v3376_v36 = vpop.f32.mrb[26].mxu0  ;;  %v1376_v51 = vrot.slane %v5617_v31, 2  ;;  %v1378_v5 = vrot.slane %v3241_v42, 2  ;;  %v6163_v42 = vld [vmem:[#allocation19_spill] sm:$0xff] }
 0x13d   : > { %v3465_v16 = vpop.f32.mrb[27].mxu1  ;;  %v3377_v40 = vpop.f32.mrb[27].mxu0 }
 0x13e   : > { %v5633_v26 = vadd.f32 %v3463_v34, %v2222_v41  ;;  %v3466_v13 = vadd.f32 %v3465_v16, %v3464_v27  ;;  %v5635_v61 = vadd.f32 %v3377_v40, %v3376_v36  ;;  %v1377_v27 = vsel %vm461_vm1, %v1375_v56, %v1376_v51 }
 0x13f   : > { %2791 = vmatmul.mubr.bf16.gmra.mrb[132].mxu1 %v6158_v24  ;;  %3830 = vmatmul.mubr.bf16.gmra.mrb[132].mxu0 %v1423_v49  ;;  %v1379_v36 = vsel %vm461_vm1, %v1376_v51, %v1378_v5 }
 0x140   : > { %v5640_v44 = vadd.f32 %v3466_v13, %v2225_v8  ;;  %2798 = vmatprep.mubr.bf16.mxu1 %v1282_v30  ;;  %3833 = vmatprep.mubr.bf16.mxu0 %v1424_v17  ;;  %v1426_v30 = vpack.c.bf16 %v1374_v2, %v6162_v48  ;;  %v1427_v8 = vpack.c.bf16 %v1379_v36, %v1377_v27 }
 0x141   : > { %v2238_v13 = vadd.f32 %v5568_v33, %v5562_v38  ;;  %v2241_v2 = vadd.f32 %v5577_v52, %v5562_v38 }
 0x142   : > { %v3467_v50 = vpop.f32.mrb[28].mxu1  ;;  %v3379_v19 = vpop.f32.mrb[28].mxu0 }
 0x143   : > { %v3468_v29 = vpop.f32.mrb[29].mxu1  ;;  %v3380_v47 = vpop.f32.mrb[29].mxu0 }
 0x144   : > { %v3469_v49 = vadd.f32 %v3468_v29, %v3467_v50  ;;  %v3470_v3 = vpop.f32.mrb[30].mxu1  ;;  %v5651_v46 = vadd.f32 %v3380_v47, %v3379_v19  ;;  %v3382_v0 = vpop.f32.mrb[30].mxu0  ;;  %v2246_v47 = vadd.f32 %v5595_v1, %v5562_v38 }
 0x145   : > { %v3471_v54 = vpop.f32.mrb[31].mxu1  ;;  %v3383_v17 = vpop.f32.mrb[31].mxu0 }
 0x146   : > { %v5656_v39 = vadd.f32 %v3469_v49, %v2230_v9  ;;  %v3472_v41 = vadd.f32 %v3471_v54, %v3470_v3  ;;  %v5658_v34 = vadd.f32 %v3383_v17, %v3382_v0  ;;  %v2249_v49 = vadd.f32 %v5602_v11, %v5562_v38 }
 0x147   : > { %2799 = vmatmul.mubr.bf16.gmra.mrb[136].mxu1 %v6163_v42  ;;  %3834 = vmatmul.mubr.bf16.gmra.mrb[136].mxu0 %v1425_v59 }
 0x148   : > { %v5661_v63 = vadd.f32 %v3472_v41, %v2233_v10  ;;  %2806 = vmatprep.mubr.bf16.mxu1 %v1283_v6  ;;  %3837 = vmatprep.mubr.bf16.mxu0 %v1426_v30  ;;  %v2254_v41 = vadd.f32 %v5628_v43, %v5562_v38 }
 0x14a   : > { %v3473_v32 = vpop.f32.mrb[32].mxu1  ;;  %v3385_v16 = vpop.f32.mrb[32].mxu0 }
 0x14b   : > { %v3474_v40 = vpop.f32.mrb[33].mxu1  ;;  %v3386_v15 = vpop.f32.mrb[33].mxu0 }
 0x14c   : > { %v3475_v24 = vadd.f32 %v3474_v40, %v3473_v32  ;;  %v3476_v57 = vpop.f32.mrb[34].mxu1  ;;  %v5669_v25 = vadd.f32 %v3386_v15, %v3385_v16  ;;  %v3388_v60 = vpop.f32.mrb[34].mxu0  ;;  %v2257_v40 = vadd.f32 %v5635_v61, %v5562_v38 }
 0x14d   : > { %v3477_v62 = vpop.f32.mrb[35].mxu1  ;;  %v3389_v22 = vpop.f32.mrb[35].mxu0 }
 0x14e   : > { %v5673_v50 = vadd.f32 %v3475_v24, %v2238_v13  ;;  %v3478_v19 = vadd.f32 %v3477_v62, %v3476_v57  ;;  %v3390_v18 = vadd.f32 %v3389_v22, %v3388_v60  ;;  %v2262_v62 = vadd.f32 %v5651_v46, %v5562_v38 }
 0x14f   : > { %2807 = vmatmul.mubr.bf16.gmra.mrb[140].mxu1 %v1091_v14  ;;  %3838 = vmatmul.mubr.bf16.gmra.mrb[140].mxu0 %v1427_v8 }
 0x150   : > { %v5675_v45 = vadd.f32 %v3478_v19, %v2241_v2 }
 0x152   : > { %v3479_v31 = vpop.f32.mrb[36].mxu1  ;;  %v3391_v33 = vpop.f32.mrb[36].mxu0 }
 0x153   : > { %v3480_v59 = vpop.f32.mrb[37].mxu1  ;;  %v3392_v29 = vpop.f32.mrb[37].mxu0 }
 0x154   : > { %v3481_v6 = vadd.f32 %v3480_v59, %v3479_v31  ;;  %v3482_v56 = vpop.f32.mrb[38].mxu1  ;;  %v5679_v51 = vadd.f32 %v3392_v29, %v3391_v33  ;;  %v3394_v52 = vpop.f32.mrb[38].mxu0  ;;  %v2265_v59 = vadd.f32 %v5658_v34, %v5562_v38  ;;  %v2273_v34 = vadd.f32 %v3390_v18, %v5562_v38 }
 0x155   : > { %v3483_v5 = vpop.f32.mrb[39].mxu1  ;;  %v3395_v9 = vpop.f32.mrb[39].mxu0 }
 0x156   : > { %v5683_v3 = vadd.f32 %v3481_v6, %v2246_v47  ;;  %v3484_v0 = vadd.f32 %v3483_v5, %v3482_v56  ;;  %v3396_v48 = vadd.f32 %v3395_v9, %v3394_v52  ;;  %v2278_v18 = vadd.f32 %v5679_v51, %v5562_v38 }
 0x158   : > { %v5685_v30 = vadd.f32 %v3484_v0, %v2249_v49  ;;  %v2270_v49 = vadd.f32 %v5669_v25, %v5562_v38 }
 0x15a   : > { %v3485_v54 = vpop.f32.mrb[40].mxu1  ;;  %v3397_v17 = vpop.f32.mrb[40].mxu0 }
 0x15b   : > { %v3486_v10 = vpop.f32.mrb[41].mxu1  ;;  %v3398_v1 = vpop.f32.mrb[41].mxu0 }
 0x15c   : > { %v3487_v42 = vadd.f32 %v3486_v10, %v3485_v54  ;;  %v3488_v27 = vpop.f32.mrb[42].mxu1  ;;  %v5689_v36 = vadd.f32 %v3398_v1, %v3397_v17  ;;  %v3400_v32 = vpop.f32.mrb[42].mxu0 }
 0x15d   : > { %v3489_v16 = vpop.f32.mrb[43].mxu1  ;;  %v3401_v11 = vpop.f32.mrb[43].mxu0 }
 0x15e   : > { %v5693_v15 = vadd.f32 %v3487_v42, %v2254_v41  ;;  %v3490_v14 = vadd.f32 %v3489_v16, %v3488_v27  ;;  %v5695_v8 = vadd.f32 %v3401_v11, %v3400_v32 }
 0x160   : > { %v5697_v13 = vadd.f32 %v3490_v14, %v2257_v40 }
 0x162   : > { %v3491_v24 = vpop.f32.mrb[44].mxu1  ;;  %v3403_v57 = vpop.f32.mrb[44].mxu0 }
 0x163   : > { %v3492_v43 = vpop.f32.mrb[45].mxu1  ;;  %v3404_v60 = vpop.f32.mrb[45].mxu0 }
 0x164   : > { %v3493_v22 = vadd.f32 %v3492_v43, %v3491_v24  ;;  %v3494_v2 = vpop.f32.mrb[46].mxu1  ;;  %v5701_v19 = vadd.f32 %v3404_v60, %v3403_v57  ;;  %v3406_v31 = vpop.f32.mrb[46].mxu0 }
 0x165   : > { %v3495_v61 = vpop.f32.mrb[47].mxu1  ;;  %v3407_v33 = vpop.f32.mrb[47].mxu0 }
 0x166   : > { %v5705_v29 = vadd.f32 %v3493_v22, %v2262_v62  ;;  %v3496_v47 = vadd.f32 %v3495_v61, %v3494_v2  ;;  %v5707_v6 = vadd.f32 %v3407_v33, %v3406_v31 }
 0x168   : > { %v5709_v56 = vadd.f32 %v3496_v47, %v2265_v59 }
 0x16a   : > { %v3497_v52 = vpop.f32.mrb[48].mxu1  ;;  %v3561_v5 = vpop.f32.mrb[48].mxu0 }
 0x16b   : > { %v3498_v46 = vpop.f32.mrb[49].mxu1  ;;  %v3562_v9 = vpop.f32.mrb[49].mxu0 }
 0x16c   : > { %v3499_v0 = vadd.f32 %v3498_v46, %v3497_v52  ;;  %v3563_v54 = vadd.f32 %v3562_v9, %v3561_v5  ;;  %v3500_v17 = vpop.f32.mrb[50].mxu1  ;;  %v3564_v10 = vpop.f32.mrb[50].mxu0 }
 0x16d   : > { %v3501_v1 = vpop.f32.mrb[51].mxu1  ;;  %v3565_v41 = vpop.f32.mrb[51].mxu0 }
 0x16e   : > { %v5714_v42 = vadd.f32 %v3499_v0, %v2270_v49  ;;  %v5717_v27 = vadd.f32 %v3563_v54, %v5575_v23  ;;  %v3502_v32 = vadd.f32 %v3501_v1, %v3500_v17  ;;  %v3566_v16 = vadd.f32 %v3565_v41, %v3564_v10 }
 0x16f   : > { %v2281_v23 = vadd.f32 %v3396_v48, %v5562_v38  ;;  %v2286_v48 = vadd.f32 %v5689_v36, %v5562_v38 }
 0x170   : > { %v5719_v11 = vadd.f32 %v3502_v32, %v2273_v34  ;;  %v5722_v40 = vadd.f32 %v3566_v16, %v5582_v58 }
 0x172   : > { %v3503_v25 = vpop.f32.mrb[52].mxu1  ;;  %v3567_v14 = vpop.f32.mrb[52].mxu0 }
 0x173   : > { %v3504_v24 = vpop.f32.mrb[53].mxu1  ;;  %v3568_v57 = vpop.f32.mrb[53].mxu0 }
 0x174   : > { %v3505_v43 = vadd.f32 %v3504_v24, %v3503_v25  ;;  %v3569_v60 = vadd.f32 %v3568_v57, %v3567_v14  ;;  %v3506_v62 = vpop.f32.mrb[54].mxu1  ;;  %v3570_v22 = vpop.f32.mrb[54].mxu0 }
 0x175   : > { %v3507_v2 = vpop.f32.mrb[55].mxu1  ;;  %v3571_v31 = vpop.f32.mrb[55].mxu0 }
 0x176   : > { %v5727_v61 = vadd.f32 %v3505_v43, %v2278_v18  ;;  %v5730_v58 = vadd.f32 %v3569_v60, %v5600_v53  ;;  %v3508_v33 = vadd.f32 %v3507_v2, %v3506_v62  ;;  %v3572_v59 = vadd.f32 %v3571_v31, %v3570_v22 }
 0x177   : > { %v2289_v53 = vadd.f32 %v5695_v8, %v5562_v38  ;;  %v2294_v8 = vadd.f32 %v5701_v19, %v5562_v38 }
 0x178   : > { %v5732_v47 = vadd.f32 %v3508_v33, %v2281_v23  ;;  %v5735_v52 = vadd.f32 %v3572_v59, %v5609_v28 }
 0x17a   : > { %v3509_v51 = vpop.f32.mrb[56].mxu1  ;;  %v3573_v5 = vpop.f32.mrb[56].mxu0 }
 0x17b   : > { %v3510_v46 = vpop.f32.mrb[57].mxu1  ;;  %v3574_v9 = vpop.f32.mrb[57].mxu0 }
 0x17c   : > { %v3511_v49 = vadd.f32 %v3510_v46, %v3509_v51  ;;  %v3575_v0 = vadd.f32 %v3574_v9, %v3573_v5  ;;  %v3512_v54 = vpop.f32.mrb[58].mxu1  ;;  %v3576_v17 = vpop.f32.mrb[58].mxu0 }
 0x17d   : > { %v3513_v10 = vpop.f32.mrb[59].mxu1  ;;  %v3577_v34 = vpop.f32.mrb[59].mxu0 }
 0x17e   : > { %v5741_v1 = vadd.f32 %v3511_v49, %v2286_v48  ;;  %v5744_v28 = vadd.f32 %v3575_v0, %v5633_v26  ;;  %v3514_v41 = vadd.f32 %v3513_v10, %v3512_v54  ;;  %v3578_v32 = vadd.f32 %v3577_v34, %v3576_v17 }
 0x17f   : > { %v2297_v26 = vadd.f32 %v5707_v6, %v5562_v38  ;;  %v2302_v6 = vadd.f32 %v5455_v55, %v5562_v38 }
 0x180   : > { %v5746_v16 = vadd.f32 %v3514_v41, %v2289_v53  ;;  %v5749_v36 = vadd.f32 %v3578_v32, %v5640_v44 }
 0x182   : > { %v3515_v25 = vpop.f32.mrb[60].mxu1  ;;  %v3579_v14 = vpop.f32.mrb[60].mxu0 }
 0x183   : > { %v3516_v24 = vpop.f32.mrb[61].mxu1  ;;  %v3580_v57 = vpop.f32.mrb[61].mxu0 }
 0x184   : > { %v3517_v18 = vadd.f32 %v3516_v24, %v3515_v25  ;;  %v3581_v43 = vadd.f32 %v3580_v57, %v3579_v14  ;;  %v3518_v60 = vpop.f32.mrb[62].mxu1  ;;  %v3582_v62 = vpop.f32.mrb[62].mxu0 }
 0x185   : > { %v3519_v22 = vpop.f32.mrb[63].mxu1  ;;  %v3583_v23 = vpop.f32.mrb[63].mxu0 }
 0x186   : > { %v5755_v2 = vadd.f32 %v3517_v18, %v2294_v8  ;;  %v5758_v44 = vadd.f32 %v3581_v43, %v5656_v39  ;;  %v3520_v31 = vadd.f32 %v3519_v22, %v3518_v60  ;;  %v3584_v33 = vadd.f32 %v3583_v23, %v3582_v62 }
 0x187   : > { %v2305_v39 = vadd.f32 %v5461_v37, %v5562_v38  ;;  %v2310_v37 = vadd.f32 %v5484_v4, %v5562_v38 }
 0x188   : > { %v5760_v59 = vadd.f32 %v3520_v31, %v2297_v26  ;;  %v5763_v19 = vadd.f32 %v3584_v33, %v5661_v63 }
 0x18a   : > { %v3521_v51 = vpop.f32.mrb[64].mxu1  ;;  %v3585_v5 = vpop.f32.mrb[64].mxu0 }
 0x18b   : > { %v3522_v46 = vpop.f32.mrb[65].mxu1  ;;  %v3586_v9 = vpop.f32.mrb[65].mxu0 }
 0x18c   : > { %v3523_v48 = vadd.f32 %v3522_v46, %v3521_v51  ;;  %v3587_v49 = vadd.f32 %v3586_v9, %v3585_v5  ;;  %v3524_v0 = vpop.f32.mrb[66].mxu1  ;;  %v3588_v54 = vpop.f32.mrb[66].mxu0 }
 0x18d   : > { %v3525_v17 = vpop.f32.mrb[67].mxu1  ;;  %v3589_v53 = vpop.f32.mrb[67].mxu0 }
 0x18e   : > { %v5769_v10 = vadd.f32 %v3523_v48, %v2302_v6  ;;  %v5772_v63 = vadd.f32 %v3587_v49, %v5673_v50  ;;  %v3526_v34 = vadd.f32 %v3525_v17, %v3524_v0  ;;  %v3590_v41 = vadd.f32 %v3589_v53, %v3588_v54 }
 0x18f   : > { %v2313_v50 = vadd.f32 %v5490_v20, %v5562_v38  ;;  %v2318_v20 = vadd.f32 %v5511_v21, %v5562_v38 }
 0x190   : > { %v5774_v32 = vadd.f32 %v3526_v34, %v2305_v39  ;;  %v5777_v55 = vadd.f32 %v3590_v41, %v5675_v45 }
 0x192   : > { %v3527_v25 = vpop.f32.mrb[68].mxu1  ;;  %v3591_v14 = vpop.f32.mrb[68].mxu0 }
 0x193   : > { %v3528_v24 = vpop.f32.mrb[69].mxu1  ;;  %v3592_v57 = vpop.f32.mrb[69].mxu0 }
 0x194   : > { %v3529_v8 = vadd.f32 %v3528_v24, %v3527_v25  ;;  %v3593_v18 = vadd.f32 %v3592_v57, %v3591_v14  ;;  %v3530_v43 = vpop.f32.mrb[70].mxu1  ;;  %v3594_v60 = vpop.f32.mrb[70].mxu0 }
 0x195   : > { %v3531_v62 = vpop.f32.mrb[71].mxu1  ;;  %v3595_v26 = vpop.f32.mrb[71].mxu0 }
 0x196   : > { %v5783_v22 = vadd.f32 %v3529_v8, %v2310_v37  ;;  %v5786_v45 = vadd.f32 %v3593_v18, %v5683_v3  ;;  %v3532_v23 = vadd.f32 %v3531_v62, %v3530_v43  ;;  %v3596_v31 = vadd.f32 %v3595_v26, %v3594_v60 }
 0x197   : > { %v2321_v3 = vadd.f32 %v5517_v12, %v5562_v38  ;;  %v2326_v12 = vadd.f32 %v5536_v7, %v5562_v38 }
 0x198   : > { %v5788_v33 = vadd.f32 %v3532_v23, %v2313_v50  ;;  %v5791_v4 = vadd.f32 %v3596_v31, %v5685_v30 }
 0x19a   : > { %v3533_v51 = vpop.f32.mrb[72].mxu1  ;;  %v3597_v5 = vpop.f32.mrb[72].mxu0 }
 0x19b   : > { %v3534_v46 = vpop.f32.mrb[73].mxu1  ;;  %v3598_v9 = vpop.f32.mrb[73].mxu0 }
 0x19c   : > { %v3535_v6 = vadd.f32 %v3534_v46, %v3533_v51  ;;  %v3599_v48 = vadd.f32 %v3598_v9, %v3597_v5  ;;  %v3536_v49 = vpop.f32.mrb[74].mxu1  ;;  %v3600_v0 = vpop.f32.mrb[74].mxu0 }
 0x19d   : > { %v3537_v54 = vpop.f32.mrb[75].mxu1  ;;  %v3601_v39 = vpop.f32.mrb[75].mxu0 }
 0x19e   : > { %v5797_v17 = vadd.f32 %v3535_v6, %v2318_v20  ;;  %v5800_v30 = vadd.f32 %v3599_v48, %v5693_v15  ;;  %v3538_v53 = vadd.f32 %v3537_v54, %v3536_v49  ;;  %v3602_v34 = vadd.f32 %v3601_v39, %v3600_v0 }
 0x19f   : > { %v2329_v15 = vadd.f32 %v5542_v35, %v5562_v38 }
 0x1a0   : > { %v5802_v41 = vadd.f32 %v3538_v53, %v2321_v3  ;;  %v5805_v21 = vadd.f32 %v3602_v34, %v5697_v13 }
 0x1a2   : > { %v3539_v25 = vpop.f32.mrb[76].mxu1  ;;  %v3603_v14 = vpop.f32.mrb[76].mxu0 }
 0x1a3   : > { %v3540_v24 = vpop.f32.mrb[77].mxu1  ;;  %v3604_v57 = vpop.f32.mrb[77].mxu0 }
 0x1a4   : > { %v3541_v37 = vadd.f32 %v3540_v24, %v3539_v25  ;;  %v3605_v8 = vadd.f32 %v3604_v57, %v3603_v14  ;;  %v3542_v18 = vpop.f32.mrb[78].mxu1  ;;  %v3606_v43 = vpop.f32.mrb[78].mxu0 }
 0x1a5   : > { %v3543_v60 = vpop.f32.mrb[79].mxu1  ;;  %v3607_v50 = vpop.f32.mrb[79].mxu0 }
 0x1a6   : > { %v5811_v62 = vadd.f32 %v3541_v37, %v2326_v12  ;;  %v5814_v13 = vadd.f32 %v3605_v8, %v5705_v29  ;;  %v3544_v26 = vadd.f32 %v3543_v60, %v3542_v18  ;;  %v3608_v23 = vadd.f32 %v3607_v50, %v3606_v43 }
 0x1a8   : > { %v5816_v31 = vadd.f32 %v3544_v26, %v2329_v15  ;;  %v5819_v7 = vadd.f32 %v3608_v23, %v5709_v56 }
 0x1aa   : > { %v3609_v51 = vpop.f32.mrb[80].mxu0  ;;  %v3673_v5 = vpop.f32.mrb[80].mxu1 }
 0x1ab   : > { %v3610_v46 = vpop.f32.mrb[81].mxu0  ;;  %v3674_v9 = vpop.f32.mrb[81].mxu1 }
 0x1ac   : > { %v3611_v20 = vadd.f32 %v3610_v46, %v3609_v51  ;;  %v3675_v35 = vadd.f32 %v3674_v9, %v3673_v5  ;;  %v3612_v38 = vpop.f32.mrb[82].mxu0  ;;  %v3676_v6 = vpop.f32.mrb[82].mxu1 }
 0x1ad   : > { %v3613_v48 = vpop.f32.mrb[83].mxu0  ;;  %v3677_v49 = vpop.f32.mrb[83].mxu1 }
 0x1ae   : > { %v5822_v29 = vadd.f32 %v3611_v20, %v5714_v42  ;;  %v3614_v0 = vadd.f32 %v3613_v48, %v3612_v38  ;;  %v3678_v3 = vadd.f32 %v3677_v49, %v3676_v6  ;;  %v5825_v54 = vadd.f32 %v3675_v35, %v5717_v27 }
 0x1b0   : > { %v5828_v56 = vadd.f32 %v3614_v0, %v5719_v11  ;;  %v5831_v39 = vadd.f32 %v3678_v3, %v5722_v40 }
 0x1b2   : > { %v3615_v53 = vpop.f32.mrb[84].mxu0  ;;  %v3679_v34 = vpop.f32.mrb[84].mxu1 }
 0x1b3   : > { %v3616_v25 = vpop.f32.mrb[85].mxu0  ;;  %v3680_v14 = vpop.f32.mrb[85].mxu1 }
 0x1b4   : > { %v3617_v24 = vadd.f32 %v3616_v25, %v3615_v53  ;;  %v3681_v57 = vadd.f32 %v3680_v14, %v3679_v34  ;;  %v3618_v12 = vpop.f32.mrb[86].mxu0  ;;  %v3682_v42 = vpop.f32.mrb[86].mxu1 }
 0x1b5   : > { %v3619_v37 = vpop.f32.mrb[87].mxu0  ;;  %v3683_v8 = vpop.f32.mrb[87].mxu1 }
 0x1b6   : > { %v5834_v18 = vadd.f32 %v3617_v24, %v5727_v61  ;;  %v3620_v27 = vadd.f32 %v3619_v37, %v3618_v12  ;;  %v3684_v43 = vadd.f32 %v3683_v8, %v3682_v42  ;;  %v5837_v11 = vadd.f32 %v3681_v57, %v5730_v58 }
 0x1b8   : > { %v5840_v40 = vadd.f32 %v3620_v27, %v5732_v47  ;;  %v5843_v15 = vadd.f32 %v3684_v43, %v5735_v52 }
 0x1ba   : > { %v3621_v60 = vpop.f32.mrb[88].mxu0  ;;  %v3685_v50 = vpop.f32.mrb[88].mxu1 }
 0x1bb   : > { %v3622_v26 = vpop.f32.mrb[89].mxu0  ;;  %v3686_v23 = vpop.f32.mrb[89].mxu1 }
 0x1bc   : > { %v3623_v51 = vadd.f32 %v3622_v26, %v3621_v60  ;;  %v3687_v5 = vadd.f32 %v3686_v23, %v3685_v50  ;;  %v3624_v46 = vpop.f32.mrb[90].mxu0  ;;  %v3688_v61 = vpop.f32.mrb[90].mxu1 }
 0x1bd   : > { %v3625_v9 = vpop.f32.mrb[91].mxu0  ;;  %v3689_v20 = vpop.f32.mrb[91].mxu1 }
 0x1be   : > { %v5846_v35 = vadd.f32 %v3623_v51, %v5741_v1  ;;  %v3626_v58 = vadd.f32 %v3625_v9, %v3624_v46  ;;  %v3690_v38 = vadd.f32 %v3689_v20, %v3688_v61  ;;  %v5849_v47 = vadd.f32 %v3687_v5, %v5744_v28 }
 0x1c0   : > { %v5852_v52 = vadd.f32 %v3626_v58, %v5746_v16  ;;  %v5855_v6 = vadd.f32 %v3690_v38, %v5749_v36 }
 0x1c2   : > { %v3627_v48 = vpop.f32.mrb[92].mxu0  ;;  %v3691_v49 = vpop.f32.mrb[92].mxu1 }
 0x1c3   : > { %v3628_v0 = vpop.f32.mrb[93].mxu0  ;;  %v3692_v3 = vpop.f32.mrb[93].mxu1 }
 0x1c4   : > { %v3629_v53 = vadd.f32 %v3628_v0, %v3627_v48  ;;  %v3693_v34 = vadd.f32 %v3692_v3, %v3691_v49  ;;  %v3630_v25 = vpop.f32.mrb[94].mxu0  ;;  %v3694_v1 = vpop.f32.mrb[94].mxu1 }
 0x1c5   : > { %v3631_v14 = vpop.f32.mrb[95].mxu0  ;;  %v3695_v24 = vpop.f32.mrb[95].mxu1 }
 0x1c6   : > { %v5858_v57 = vadd.f32 %v3629_v53, %v5755_v2  ;;  %v3632_v28 = vadd.f32 %v3631_v14, %v3630_v25  ;;  %v3696_v12 = vadd.f32 %v3695_v24, %v3694_v1  ;;  %v5861_v16 = vadd.f32 %v3693_v34, %v5758_v44 }
 0x1c8   : > { %v5864_v36 = vadd.f32 %v3632_v28, %v5760_v59  ;;  %v5867_v42 = vadd.f32 %v3696_v12, %v5763_v19 }
 0x1ca   : > { %v3633_v37 = vpop.f32.mrb[96].mxu0  ;;  %v3697_v8 = vpop.f32.mrb[96].mxu1 }
 0x1cb   : > { %v3634_v27 = vpop.f32.mrb[97].mxu0  ;;  %v3698_v43 = vpop.f32.mrb[97].mxu1 }
 0x1cc   : > { %v3635_v60 = vadd.f32 %v3634_v27, %v3633_v37  ;;  %v3699_v50 = vadd.f32 %v3698_v43, %v3697_v8  ;;  %v3636_v26 = vpop.f32.mrb[98].mxu0  ;;  %v3700_v2 = vpop.f32.mrb[98].mxu1 }
 0x1cd   : > { %v3637_v23 = vpop.f32.mrb[99].mxu0  ;;  %v3701_v51 = vpop.f32.mrb[99].mxu1 }
 0x1ce   : > { %v5870_v5 = vadd.f32 %v3635_v60, %v5769_v10  ;;  %v3638_v44 = vadd.f32 %v3637_v23, %v3636_v26  ;;  %v3702_v46 = vadd.f32 %v3701_v51, %v3700_v2  ;;  %v5873_v59 = vadd.f32 %v3699_v50, %v5772_v63 }
 0x1d0   : > { %v5876_v19 = vadd.f32 %v3638_v44, %v5774_v32  ;;  %v5879_v61 = vadd.f32 %v3702_v46, %v5777_v55 }
 0x1d2   : > { %v3639_v9 = vpop.f32.mrb[100].mxu0  ;;  %v3703_v20 = vpop.f32.mrb[100].mxu1 }
 0x1d3   : > { %v3640_v58 = vpop.f32.mrb[101].mxu0  ;;  %v3704_v38 = vpop.f32.mrb[101].mxu1 }
 0x1d4   : > { %v3641_v48 = vadd.f32 %v3640_v58, %v3639_v9  ;;  %v3705_v49 = vadd.f32 %v3704_v38, %v3703_v20  ;;  %v3642_v0 = vpop.f32.mrb[102].mxu0  ;;  %v3706_v10 = vpop.f32.mrb[102].mxu1 }
 0x1d5   : > { %v3643_v3 = vpop.f32.mrb[103].mxu0  ;;  %v3707_v53 = vpop.f32.mrb[103].mxu1 }
 0x1d6   : > { %v5882_v34 = vadd.f32 %v3641_v48, %v5783_v22  ;;  %v3644_v63 = vadd.f32 %v3643_v3, %v3642_v0  ;;  %v3708_v25 = vadd.f32 %v3707_v53, %v3706_v10  ;;  %v5885_v32 = vadd.f32 %v3705_v49, %v5786_v45 }
 0x1d8   : > { %v5888_v55 = vadd.f32 %v3644_v63, %v5788_v33  ;;  %v5891_v1 = vadd.f32 %v3708_v25, %v5791_v4 }
 0x1da   : > { %v3645_v14 = vpop.f32.mrb[104].mxu0  ;;  %v3709_v24 = vpop.f32.mrb[104].mxu1 }
 0x1db   : > { %v3646_v28 = vpop.f32.mrb[105].mxu0  ;;  %v3710_v12 = vpop.f32.mrb[105].mxu1 }
 0x1dc   : > { %v3647_v37 = vadd.f32 %v3646_v28, %v3645_v14  ;;  %v3711_v8 = vadd.f32 %v3710_v12, %v3709_v24  ;;  %v3648_v27 = vpop.f32.mrb[106].mxu0  ;;  %v3712_v22 = vpop.f32.mrb[106].mxu1 }
 0x1dd   : > { %v3649_v43 = vpop.f32.mrb[107].mxu0  ;;  %v3713_v60 = vpop.f32.mrb[107].mxu1 }
 0x1de   : > { %v5894_v50 = vadd.f32 %v3647_v37, %v5797_v17  ;;  %v3650_v45 = vadd.f32 %v3649_v43, %v3648_v27  ;;  %v3714_v26 = vadd.f32 %v3713_v60, %v3712_v22  ;;  %v5897_v33 = vadd.f32 %v3711_v8, %v5800_v30 }
 0x1e0   : > { %v5900_v4 = vadd.f32 %v3650_v45, %v5802_v41  ;;  %v5903_v2 = vadd.f32 %v3714_v26, %v5805_v21 }
 0x1e2   : > { %v3651_v23 = vpop.f32.mrb[108].mxu0  ;;  %v3715_v51 = vpop.f32.mrb[108].mxu1 }
 0x1e3   : > { %v3652_v44 = vpop.f32.mrb[109].mxu0  ;;  %v3716_v46 = vpop.f32.mrb[109].mxu1 }
 0x1e4   : > { %v3653_v9 = vadd.f32 %v3652_v44, %v3651_v23  ;;  %v3717_v17 = vadd.f32 %v3716_v46, %v3715_v51  ;;  %v3654_v20 = vpop.f32.mrb[110].mxu0  ;;  %v3718_v58 = vpop.f32.mrb[110].mxu1 }
 0x1e5   : > { %v3655_v38 = vpop.f32.mrb[111].mxu0  ;;  %v3719_v48 = vpop.f32.mrb[111].mxu1 }
 0x1e6   : > { %v5906_v30 = vadd.f32 %v3653_v9, %v5811_v62  ;;  %v3656_v49 = vadd.f32 %v3655_v38, %v3654_v20  ;;  %v3720_v41 = vadd.f32 %v3719_v48, %v3718_v58  ;;  %v5910_v21 = vadd.f32 %v3717_v17, %v5814_v13 }
 0x1e8   : > { %v5913_v0 = vadd.f32 %v3656_v49, %v5816_v31  ;;  %v5916_v10 = vadd.f32 %v3720_v41, %v5819_v7 }
 0x1ea   : > { %v3721_v3 = vpop.f32.mrb[112].mxu1  ;;  %v3811_v53 = vpop.f32.mrb[112].mxu0 }
 0x1eb   : > { %v2858_v63 = vadd.f32 %v3811_v53, %v5837_v11  ;;  %v3722_v62 = vpop.f32.mrb[113].mxu1  ;;  %v2849_v25 = vpop.f32.mrb[113].mxu0 }
 0x1ec   : > { %v3723_v14 = vadd.f32 %v3722_v62, %v3721_v3  ;;  %v2850_v24 = vadd.f32 %v2849_v25, %v5825_v54  ;;  %v3724_v28 = vpop.f32.mrb[114].mxu1  ;;  %v3812_v13 = vpop.f32.mrb[114].mxu0 }
 0x1ed   : > { %v2978_v12 = vmax.f32 %v2858_v63, 0.0  ;;  %v2861_v31 = vadd.f32 %v3812_v13, %v5843_v15  ;;  %v3725_v37 = vpop.f32.mrb[115].mxu1  ;;  %v2852_v8 = vpop.f32.mrb[115].mxu0 }
 0x1ee   : > { %v2976_v7 = vmax.f32 %v2850_v24, 0.0  ;;  %v3726_v27 = vadd.f32 %v3725_v37, %v3724_v28  ;;  %v2853_v22 = vadd.f32 %v2852_v8, %v5831_v39  ;;  %v5925_v43 = vadd.f32 %v3723_v14, %v5822_v29 }
 0x1ef   : > { %3010 = vst [vmem:[%s5927_s6 + $0x10] sm:$0xff] %v2978_v12  ;;  %v2979_v54 = vmax.f32 %v2861_v31, 0.0 }
 0x1f0   : > { %3008 = vst [vmem:[%s5927_s6] sm:$0xff] %v2976_v7  ;;  %v2977_v11 = vmax.f32 %v2853_v22, 0.0  ;;  %v5932_v15 = vadd.f32 %v3726_v27, %v5828_v56 }
 0x1f1   : > { %3011 = vst [vmem:[%s5927_s6 + $0x18] sm:$0xff] %v2979_v54 }
 0x1f2   : > { %3009 = vst [vmem:[%s5927_s6 + $0x8] sm:$0xff] %v2977_v11  ;;  %v3727_v60 = vpop.f32.mrb[116].mxu1  ;;  %v3815_v39 = vpop.f32.mrb[116].mxu0 }
 0x1f3   : > { %v2874_v29 = vadd.f32 %v3815_v39, %v5861_v16  ;;  %v3728_v45 = vpop.f32.mrb[117].mxu1  ;;  %v2865_v26 = vpop.f32.mrb[117].mxu0 }
 0x1f4   : > { %v3729_v23 = vadd.f32 %v3728_v45, %v3727_v60  ;;  %v2866_v51 = vadd.f32 %v2865_v26, %v5849_v47  ;;  %v3730_v44 = vpop.f32.mrb[118].mxu1  ;;  %v3816_v46 = vpop.f32.mrb[118].mxu0 }
 0x1f5   : > { %v2982_v9 = vmax.f32 %v2874_v29, 0.0  ;;  %v2877_v56 = vadd.f32 %v3816_v46, %v5867_v42  ;;  %v3731_v17 = vpop.f32.mrb[119].mxu1  ;;  %v2868_v20 = vpop.f32.mrb[119].mxu0 }
 0x1f6   : > { %v2980_v58 = vmax.f32 %v2866_v51, 0.0  ;;  %v3732_v38 = vadd.f32 %v3731_v17, %v3730_v44  ;;  %v2869_v48 = vadd.f32 %v2868_v20, %v5855_v6  ;;  %v2761_v16 = vadd.f32 %v3729_v23, %v5834_v18 }
 0x1f7   : > { %3014 = vst [vmem:[%s5927_s6 + $0x30] sm:$0xff] %v2982_v9  ;;  %v2983_v49 = vmax.f32 %v2877_v56, 0.0 }
 0x1f8   : > { %3012 = vst [vmem:[%s5927_s6 + $0x20] sm:$0xff] %v2980_v58  ;;  %v2981_v41 = vmax.f32 %v2869_v48, 0.0  ;;  %v2764_v47 = vadd.f32 %v3732_v38, %v5840_v40 }
 0x1f9   : > { %3015 = vst [vmem:[%s5927_s6 + $0x38] sm:$0xff] %v2983_v49 }
 0x1fa   : > { %3013 = vst [vmem:[%s5927_s6 + $0x28] sm:$0xff] %v2981_v41  ;;  %v3733_v3 = vpop.f32.mrb[120].mxu1  ;;  %v3819_v53 = vpop.f32.mrb[120].mxu0 }
 0x1fb   : > { %v2890_v42 = vadd.f32 %v3819_v53, %v5885_v32  ;;  %v3734_v63 = vpop.f32.mrb[121].mxu1  ;;  %v2881_v62 = vpop.f32.mrb[121].mxu0 }
 0x1fc   : > { %v3735_v25 = vadd.f32 %v3734_v63, %v3733_v3  ;;  %v2882_v6 = vadd.f32 %v2881_v62, %v5873_v59  ;;  %v3736_v18 = vpop.f32.mrb[122].mxu1  ;;  %v3820_v14 = vpop.f32.mrb[122].mxu0 }
 0x1fd   : > { %v2986_v24 = vmax.f32 %v2890_v42, 0.0  ;;  %v2893_v40 = vadd.f32 %v3820_v14, %v5891_v1  ;;  %v3737_v28 = vpop.f32.mrb[123].mxu1  ;;  %v2884_v13 = vpop.f32.mrb[123].mxu0 }
 0x1fe   : > { %v2984_v12 = vmax.f32 %v2882_v6, 0.0  ;;  %v3738_v31 = vadd.f32 %v3737_v28, %v3736_v18  ;;  %v2885_v37 = vadd.f32 %v2884_v13, %v5879_v61  ;;  %v2769_v32 = vadd.f32 %v3735_v25, %v5846_v35 }
 0x1ff   : > { %3018 = vst [vmem:[%s5927_s6 + $0x50] sm:$0xff] %v2986_v24  ;;  %v2987_v8 = vmax.f32 %v2893_v40, 0.0 }
 0x200   : > { %3016 = vst [vmem:[%s5927_s6 + $0x40] sm:$0xff] %v2984_v12  ;;  %v2985_v7 = vmax.f32 %v2885_v37, 0.0  ;;  %v5954_v59 = vadd.f32 %v3738_v31, %v5852_v52 }
 0x201   : > { %3019 = vst [vmem:[%s5927_s6 + $0x58] sm:$0xff] %v2987_v8 }
 0x202   : > { %3017 = vst [vmem:[%s5927_s6 + $0x48] sm:$0xff] %v2985_v7  ;;  %v3739_v27 = vpop.f32.mrb[124].mxu1  ;;  %v3823_v22 = vpop.f32.mrb[124].mxu0 }
 0x203   : > { %v2906_v1 = vadd.f32 %v3823_v22, %v5910_v21  ;;  %v3740_v54 = vpop.f32.mrb[125].mxu1  ;;  %v2897_v11 = vpop.f32.mrb[125].mxu0 }
 0x204   : > { %v3741_v61 = vadd.f32 %v3740_v54, %v3739_v27  ;;  %v2898_v35 = vadd.f32 %v2897_v11, %v5897_v33  ;;  %v3742_v60 = vpop.f32.mrb[126].mxu1  ;;  %v3824_v39 = vpop.f32.mrb[126].mxu0 }
 0x205   : > { %v2990_v29 = vmax.f32 %v2906_v1, 0.0  ;;  %v2909_v52 = vadd.f32 %v3824_v39, %v5916_v10  ;;  %v3743_v45 = vpop.f32.mrb[127].mxu1  ;;  %v2900_v26 = vpop.f32.mrb[127].mxu0 }
 0x206   : > { %v2988_v23 = vmax.f32 %v2898_v35, 0.0  ;;  %v3744_v51 = vadd.f32 %v3743_v45, %v3742_v60  ;;  %v2901_v44 = vadd.f32 %v2900_v26, %v5903_v2  ;;  %v2777_v21 = vadd.f32 %v3741_v61, %v5858_v57 }
 0x207   : > { %3022 = vst [vmem:[%s5927_s6 + $0x70] sm:$0xff] %v2990_v29  ;;  %v2991_v46 = vmax.f32 %v2909_v52, 0.0 }
 0x208   : > { %3020 = vst [vmem:[%s5927_s6 + $0x60] sm:$0xff] %v2988_v23  ;;  %v2989_v9 = vmax.f32 %v2901_v44, 0.0  ;;  %v2780_v33 = vadd.f32 %v3744_v51, %v5864_v36 }
 0x209   : > { %3023 = vst [vmem:[%s5927_s6 + $0x78] sm:$0xff] %v2991_v46 }
 0x20a   : > { %3021 = vst [vmem:[%s5927_s6 + $0x68] sm:$0xff] %v2989_v9  ;;  %v3745_v56 = vpop.f32.mrb[128].mxu1  ;;  %v3827_v17 = vpop.f32.mrb[128].mxu0 }
 0x20b   : > { %v2922_v10 = vadd.f32 %v3827_v17, %v2761_v16  ;;  %v3746_v20 = vpop.f32.mrb[129].mxu1  ;;  %v2913_v58 = vpop.f32.mrb[129].mxu0 }
 0x20c   : > { %v3747_v38 = vadd.f32 %v3746_v20, %v3745_v56  ;;  %v2914_v2 = vadd.f32 %v2913_v58, %v5925_v43  ;;  %v3748_v57 = vpop.f32.mrb[130].mxu1  ;;  %v3828_v48 = vpop.f32.mrb[130].mxu0 }
 0x20d   : > { %v2994_v49 = vmax.f32 %v2922_v10, 0.0  ;;  %v2925_v41 = vadd.f32 %v3828_v48, %v2764_v47  ;;  %v3749_v3 = vpop.f32.mrb[131].mxu1  ;;  %v2916_v36 = vpop.f32.mrb[131].mxu0 }
 0x20e   : > { %v2992_v53 = vmax.f32 %v2914_v2, 0.0  ;;  %v3750_v42 = vadd.f32 %v3749_v3, %v3748_v57  ;;  %v2917_v63 = vadd.f32 %v2916_v36, %v5932_v15  ;;  %v2785_v16 = vadd.f32 %v3747_v38, %v5870_v5 }
 0x20f   : > { %3026 = vst [vmem:[%s5927_s6 + $0x90] sm:$0xff] %v2994_v49  ;;  %v2995_v62 = vmax.f32 %v2925_v41, 0.0 }
 0x210   : > { %3024 = vst [vmem:[%s5927_s6 + $0x80] sm:$0xff] %v2992_v53  ;;  %v2993_v25 = vmax.f32 %v2917_v63, 0.0  ;;  %v2788_v43 = vadd.f32 %v3750_v42, %v5876_v19 }
 0x211   : > { %3027 = vst [vmem:[%s5927_s6 + $0x98] sm:$0xff] %v2995_v62 }
 0x212   : > { %3025 = vst [vmem:[%s5927_s6 + $0x88] sm:$0xff] %v2993_v25  ;;  %v3751_v6 = vpop.f32.mrb[132].mxu1  ;;  %v3831_v18 = vpop.f32.mrb[132].mxu0 }
 0x213   : > { %v2938_v47 = vadd.f32 %v3831_v18, %v2777_v21  ;;  %v3752_v14 = vpop.f32.mrb[133].mxu1  ;;  %v2929_v24 = vpop.f32.mrb[133].mxu0 }
 0x214   : > { %v3753_v40 = vadd.f32 %v3752_v14, %v3751_v6  ;;  %v2930_v28 = vadd.f32 %v2929_v24, %v2769_v32  ;;  %v3754_v15 = vpop.f32.mrb[134].mxu1  ;;  %v3832_v5 = vpop.f32.mrb[134].mxu0 }
 0x215   : > { %v2998_v13 = vmax.f32 %v2938_v47, 0.0  ;;  %v2941_v12 = vadd.f32 %v3832_v5, %v2780_v33  ;;  %v3755_v31 = vpop.f32.mrb[135].mxu1  ;;  %v2932_v37 = vpop.f32.mrb[135].mxu0 }
 0x216   : > { %v2996_v19 = vmax.f32 %v2930_v28, 0.0  ;;  %v3756_v8 = vadd.f32 %v3755_v31, %v3754_v15  ;;  %v2933_v7 = vadd.f32 %v2932_v37, %v5954_v59  ;;  %v2793_v27 = vadd.f32 %v3753_v40, %v5882_v34 }
 0x217   : > { %3030 = vst [vmem:[%s5927_s6 + $0xb0] sm:$0xff] %v2998_v13  ;;  %v2999_v22 = vmax.f32 %v2941_v12, 0.0 }
 0x218   : > { %3028 = vst [vmem:[%s5927_s6 + $0xa0] sm:$0xff] %v2996_v19  ;;  %v2997_v1 = vmax.f32 %v2933_v7, 0.0  ;;  %v2796_v32 = vadd.f32 %v3756_v8, %v5888_v55 }
 0x219   : > { %3031 = vst [vmem:[%s5927_s6 + $0xb8] sm:$0xff] %v2999_v22 }
 0x21a   : > { %3029 = vst [vmem:[%s5927_s6 + $0xa8] sm:$0xff] %v2997_v1  ;;  %v3757_v54 = vpop.f32.mrb[136].mxu1  ;;  %v3835_v11 = vpop.f32.mrb[136].mxu0 }
 0x21b   : > { %v2954_v61 = vadd.f32 %v3835_v11, %v2793_v27  ;;  %v3758_v35 = vpop.f32.mrb[137].mxu1  ;;  %v2945_v60 = vpop.f32.mrb[137].mxu0 }
 0x21c   : > { %v3759_v39 = vadd.f32 %v3758_v35, %v3757_v54  ;;  %v2946_v29 = vadd.f32 %v2945_v60, %v2785_v16  ;;  %v3760_v59 = vpop.f32.mrb[138].mxu1  ;;  %v3836_v34 = vpop.f32.mrb[138].mxu0 }
 0x21d   : > { %v3002_v52 = vmax.f32 %v2954_v61, 0.0  ;;  %v2957_v45 = vadd.f32 %v3836_v34, %v2796_v32  ;;  %v3761_v26 = vpop.f32.mrb[139].mxu1  ;;  %v2948_v23 = vpop.f32.mrb[139].mxu0 }
 0x21e   : > { %v3000_v55 = vmax.f32 %v2946_v29, 0.0  ;;  %v3762_v51 = vadd.f32 %v3761_v26, %v3760_v59  ;;  %v2949_v44 = vadd.f32 %v2948_v23, %v2788_v43  ;;  %v2801_v21 = vadd.f32 %v3759_v39, %v5894_v50 }
 0x21f   : > { %3034 = vst [vmem:[%s5927_s6 + $0xd0] sm:$0xff] %v3002_v52  ;;  %v3003_v46 = vmax.f32 %v2957_v45, 0.0 }
 0x220   : > { %3032 = vst [vmem:[%s5927_s6 + $0xc0] sm:$0xff] %v3000_v55  ;;  %v3001_v9 = vmax.f32 %v2949_v44, 0.0  ;;  %v2804_v33 = vadd.f32 %v3762_v51, %v5900_v4 }
 0x221   : > { %3035 = vst [vmem:[%s5927_s6 + $0xd8] sm:$0xff] %v3003_v46 }
 0x222   : > { %3033 = vst [vmem:[%s5927_s6 + $0xc8] sm:$0xff] %v3001_v9  ;;  %v3763_v56 = vpop.f32.mrb[140].mxu1  ;;  %v3839_v17 = vpop.f32.mrb[140].mxu0 }
 0x223   : > { %v3764_v10 = vpop.f32.mrb[141].mxu1  ;;  %v2961_v20 = vpop.f32.mrb[141].mxu0 }
 0x224   : > { %v3765_v58 = vadd.f32 %v3764_v10, %v3763_v56  ;;  %v2962_v38 = vadd.f32 %v2961_v20, %v2801_v21  ;;  %v3766_v2 = vpop.f32.mrb[142].mxu1  ;;  %v3840_v50 = vpop.f32.mrb[142].mxu0 }
 0x225   : > { %v3767_v57 = vpop.f32.mrb[143].mxu1  ;;  %v2964_v48 = vpop.f32.mrb[143].mxu0 }
 0x226   : > { %v2809_v49 = vadd.f32 %v3765_v58, %v5906_v30  ;;  %v3004_v4 = vmax.f32 %v2962_v38, 0.0  ;;  %v3768_v41 = vadd.f32 %v3767_v57, %v3766_v2  ;;  %v2965_v3 = vadd.f32 %v2964_v48, %v2804_v33 }
 0x228   : > { %v2970_v36 = vadd.f32 %v3839_v17, %v2809_v49  ;;  %3036 = vst [vmem:[%s5927_s6 + $0xe0] sm:$0xff] %v3004_v4  ;;  %v2812_v53 = vadd.f32 %v3768_v41, %v5913_v0  ;;  %v3005_v42 = vmax.f32 %v2965_v3, 0.0 }
 0x22a   : > { %v3006_v63 = vmax.f32 %v2970_v36, 0.0  ;;  %v2973_v16 = vadd.f32 %v3840_v50, %v2812_v53  ;;  %3037 = vst [vmem:[%s5927_s6 + $0xe8] sm:$0xff] %v3005_v42 }
 0x22c   : > { %3038 = vst [vmem:[%s5927_s6 + $0xf0] sm:$0xff] %v3006_v63  ;;  %v3007_v30 = vmax.f32 %v2973_v16, 0.0 }
 0x22e   : > { %3039 = vst [vmem:[%s5927_s6 + $0xf8] sm:$0xff] %v3007_v30 }
 0x22f   : > { %4000 = shalt.err (!%p3997_p5)
}
 0x230   : > { %s4001_s26 = scalar_lea.hbm %s5998_s11, 4096  ;;  %s4005_s29 = scalar_lea.hbm %s6055_s3, 8192 }
 0x231   : > { %p4002_p6 = scmp.ne.s32.totalorder %s5998_s11, %s4001_s26  ;;  %p4006_p10 = scmp.lt.u32.totalorder %s5998_s11, %s6055_s3 }
 0x232   : > { %p4007_p11 = scmp.lt.u32.totalorder %s4005_s29, %s4001_s26  ;;  %p4009_p13 = scmp.lt.u32.totalorder %s4001_s26, %s5998_s11 }
 0x233   : > { %p4003_p7 = pnand %p4002_p6, %p4130_p4 }
 0x234   : > { %p4008_p12 = por %p4007_p11, %p4006_p10 }
 0x235   : > { %p4004_p9 = pneg %p4003_p7 }
 0x236   : > { %p4010_p0 = por %p4009_p13, %p4008_p12 }
 0x238   : > { %p4011_p1 = pnand %p4010_p0, %p4004_p9 }
 0x23a   : > { %4014 = shalt.err (!%p4011_p1)
}
 0x23b   : > { %s4068_s5 = smov 128   ;;  %s4069_s6 = smov 8  }
 0x23c   : > { %3858 = dma.vmem_to_hbm [thread:$0]  (%p4130_p4), %s6000_s8, 4096, %s5998_s11, %s6006_s18, %s4068_s5, %s4068_s5, %s4069_s6  }
 0x23d PF: > { %p3864_p2 = scmp.ge.s32.totalorder %s4065_s17, 2  ;;  %s3071_s7 = sand.u32 1, %s4045_s12  }
 0x23e   : > { %s3072_s9 = scalar_lea.sflag [#allocation4], %s3071_s7 }
 0x23f   : > { %p3861_p3 = pnand %p3864_p2, %p4137_p8 }
 0x241   : > { %4040 = dma.done.wait (!%p3861_p3), %s3072_s9, 4096  }
 0x242   : > { %4042 = vsyncadd (!%p3861_p3), %s3072_s9, 4294963200  ;;  %s16_s17 = sadd.s32 1, %s4065_s17   ;;  %s6164_s12 = smov %s4049_s13 }
 0x243   : > { %p13_p5 = scmp.ge.s32.totalorder %s16_s17, 4   ;;  %s6165_s13 = smov %s4053_s14 }
 0x244   : > { %s6166_s14 = smov %s4143_s25  ;;  %s6167_s15 = smov %s4061_s16 }
 0x245   : > { %s6168_s16 = smov %s6170_s20  ;;  %15 = sbr.rel (!%p13_p5) target bundleno = 4 (0x4), region = 70 }
 0x24c   :  { %3077 = vsyncpa [#allocation4], 1 }
 0x24d   :  { %3079 = vsyncpa [#allocation4 + $0x1], 1 }

</bundles_post_ra>
